<compile_context>
chip_gen: v7x
topology: tpu7x:2x2x1
jax: 0.10.0
libtpu: 0.0.40
codegen_flags: <defaults>
</compile_context>

<pallas_src>
import jax
import jax.numpy as jnp
from jax.experimental import pallas as pl
from jax.experimental.pallas import tpu as pltpu

LN_EPS = 1e-5  # torch.nn.LayerNorm default


def _round_up(x, m):
    return ((x + m - 1) // m) * m


def _device_budget():
    """(tb_max, vmem_limit_bytes) sized per TPU generation.

    v7x has 64 MiB VMEM per TensorCore -> smaller tile / tighter limit;
    v5e / v6e have 128 MiB -> larger batch tiles amortize per-step overhead.
    """
    try:
        kind = jax.devices()[0].device_kind.lower()
    except Exception:
        kind = ""
    if "v7" in kind:
        return 2048, 48 * 1024 * 1024
    return 4096, 96 * 1024 * 1024


def _layernorm(x, gamma, beta):
    # One-pass statistics: var = E[x^2] - E[x]^2 (clamped >= 0), f32 math.
    n = x.shape[-1]
    s = jnp.sum(x, axis=-1, keepdims=True)
    ss = jnp.sum(x * x, axis=-1, keepdims=True)
    mu = s * (1.0 / n)
    var = jnp.maximum(ss * (1.0 / n) - mu * mu, 0.0)
    return (x - mu) * jax.lax.rsqrt(var + LN_EPS) * gamma + beta


def textmf_kernel(
    p_ref, q_ref,                     # [TB, D] f32, [TB, text_dim] f32
    wt_ref, bt_ref,                   # text_proj   (bf16 W, f32 b)
    w1_ref, b1_ref, g1_ref, be1_ref,  # fc1 + ln1
    w2_ref, b2_ref, g2_ref, be2_ref,  # fc2 + ln2
    w3_ref, b3_ref,                   # fc3
    w4_ref, b4_ref,                   # fc4
    wc_ref, bc_ref,                   # classifier (padded to 128 out lanes)
    out_ref,                          # [TB, 128] f32 or bf16
):
    f32 = jnp.float32
    bf16 = jnp.bfloat16

    # q = text_proj(q): cast the streamed f32 q to bf16 only at the MXU input.
    q = jnp.dot(q_ref[...].astype(bf16), wt_ref[...],
                preferred_element_type=f32) + bt_ref[...]

    # Element-wise gating with the model embedding (both f32, matches torch).
    h = p_ref[...] * q

    # fc1 -> relu -> ln1
    h = jnp.dot(h.astype(bf16), w1_ref[...], preferred_element_type=f32) + b1_ref[...]
    h = jnp.maximum(h, 0.0)
    h = _layernorm(h, g1_ref[...], be1_ref[...])

    # fc2 -> relu -> ln2
    h = jnp.dot(h.astype(bf16), w2_ref[...], preferred_element_type=f32) + b2_ref[...]
    h = jnp.maximum(h, 0.0)
    h = _layernorm(h, g2_ref[...], be2_ref[...])

    # fc3 -> relu
    h = jnp.dot(h.astype(bf16), w3_ref[...], preferred_element_type=f32) + b3_ref[...]
    h = jnp.maximum(h, 0.0)

    # fc4 -> relu
    h = jnp.dot(h.astype(bf16), w4_ref[...], preferred_element_type=f32) + b4_ref[...]
    h = jnp.maximum(h, 0.0)

    # classifier (lane-dense, 128-wide padded output)
    out_ref[...] = (
        jnp.dot(h.astype(bf16), wc_ref[...], preferred_element_type=f32) + bc_ref[...]
    ).astype(out_ref.dtype)


def _act_spec(block_shape):
    # Activation blocks stream along the batch grid axis.
    return pl.BlockSpec(block_shape, lambda i: (i, 0))


def _resident_spec(block_shape):
    # Whole-array block, constant block index => stays VMEM-resident
    # (no re-DMA across grid steps).
    return pl.BlockSpec(block_shape, lambda i: (0, 0))


def textmf_forward(params, model_idx, prompt_idx, *, alpha, test_mode=True,
                   noise_key=None, tb_max=None, vmem_limit_bytes=None,
                   out_dtype=jnp.float32):
    """Embedding lookups + optional noise (glue), then the fused Pallas MLP."""
    p = jnp.take(params["P"], model_idx, axis=0)    # [B, D]      f32
    q = jnp.take(params["Q"], prompt_idx, axis=0)   # [B, text_d] f32
    if not test_mode:
        assert noise_key is not None
        q = q + jax.random.normal(noise_key, q.shape, q.dtype) * alpha
    # TODO(synk): the gathers + noise could be fused into the kernel with
    # PrefetchScalarGridSpec / pltpu PRNG; kept as XLA glue for robustness.

    B, D = p.shape
    text_dim = q.shape[1]
    num_classes = params["num_classes"]
    c_pad = params["bc"].shape[-1]                  # lane-padded class count

    d_tb, d_vmem = _device_budget()
    tb_max = tb_max if tb_max is not None else d_tb
    vmem_limit_bytes = vmem_limit_bytes if vmem_limit_bytes is not None else d_vmem

    # Batch tiling: for small batches the single block equals the full batch
    # (always layout-legal).  For larger batches use a 16-multiple tile,
    # sized so the grid has >= 2 steps (both v7x TensorCores busy), capped at
    # tb_max.  No wrapper-side padding: the last block is a partial block.
    if B <= 16:
        TB = B
    else:
        TB = min(tb_max, max(16, _round_up(pl.cdiv(B, 2), 16)))
    n_tiles = pl.cdiv(B, TB)

    kernel_args = (
        p, q,                                          # f32 activations
        params["Wt"], params["bt"],
        params["W1"], params["b1"], params["g1"], params["be1"],
        params["W2"], params["b2"], params["g2"], params["be2"],
        params["W3"], params["b3"],
        params["W4"], params["b4"],
        params["Wc"], params["bc"],
    )

    in_specs = [
        _act_spec((TB, D)),                          # p
        _act_spec((TB, text_dim)),                   # q
        _resident_spec(params["Wt"].shape), _resident_spec(params["bt"].shape),
        _resident_spec(params["W1"].shape), _resident_spec(params["b1"].shape),
        _resident_spec(params["g1"].shape), _resident_spec(params["be1"].shape),
        _resident_spec(params["W2"].shape), _resident_spec(params["b2"].shape),
        _resident_spec(params["g2"].shape), _resident_spec(params["be2"].shape),
        _resident_spec(params["W3"].shape), _resident_spec(params["b3"].shape),
        _resident_spec(params["W4"].shape), _resident_spec(params["b4"].shape),
        _resident_spec(params["Wc"].shape), _resident_spec(params["bc"].shape),
    ]
    out_specs = pl.BlockSpec((TB, c_pad), lambda i: (i, 0))

    logits_pad = pl.pallas_call(
        textmf_kernel,
        out_shape=jax.ShapeDtypeStruct((B, c_pad), out_dtype),
        grid=(n_tiles,),
        in_specs=in_specs,
        out_specs=out_specs,
        compiler_params=pltpu.CompilerParams(
            dimension_semantics=("parallel",),
            vmem_limit_bytes=vmem_limit_bytes,
        ),
    )(*kernel_args)

    return logits_pad[:, :num_classes]


def textmf_predict(params, model_idx, prompt_idx, *, alpha):
    # bf16 logits halve the kernel's HBM writeback; argmax only needs order.
    logits = textmf_forward(params, model_idx, prompt_idx, alpha=alpha,
                            test_mode=True, out_dtype=jnp.bfloat16)
    return jnp.argmax(logits, axis=1)


def init_params(key, *, num_models, num_prompts, model_embedding_dim,
                text_dim, num_classes):
    """Deterministic synthetic parameter init (shapes mirror the nn.Module).

    Weights are stored transposed ([in, out]) and pre-cast to bf16 once (no
    per-call cast kernels); biases / LN params stay f32.  The classifier is
    zero-padded along its output dim to 128 lanes for lane-dense stores.
    """
    ks = jax.random.split(key, 20)
    D = model_embedding_dim
    bf16 = jnp.bfloat16

    def lin(kw, kb, fan_in, fan_out):
        bound = 1.0 / jnp.sqrt(fan_in)
        W = jax.random.uniform(kw, (fan_in, fan_out), jnp.float32, -bound, bound)
        b = jax.random.uniform(kb, (1, fan_out), jnp.float32, -bound, bound)
        return W, b

    params = {}
    params["P"] = jax.random.normal(ks[0], (num_models, D), jnp.float32)
    params["Q"] = jax.random.normal(ks[1], (num_prompts, text_dim), jnp.float32)

    Wt, params["bt"] = lin(ks[2], ks[3], text_dim, D)
    W1, params["b1"] = lin(ks[4], ks[5], D, 512)
    W2, params["b2"] = lin(ks[6], ks[7], 512, 256)
    W3, params["b3"] = lin(ks[8], ks[9], 256, 128)
    W4, params["b4"] = lin(ks[10], ks[11], 128, 64)
    params["Wt"] = Wt.astype(bf16)
    params["W1"] = W1.astype(bf16)
    params["W2"] = W2.astype(bf16)
    params["W3"] = W3.astype(bf16)
    params["W4"] = W4.astype(bf16)

    Wc, bc = lin(ks[12], ks[13], 64, num_classes)
    c_pad = _round_up(num_classes, 128)
    params["Wc"] = jnp.pad(Wc, ((0, 0), (0, c_pad - num_classes))).astype(bf16)
    params["bc"] = jnp.pad(bc, ((0, 0), (0, c_pad - num_classes)))
    params["num_classes"] = num_classes

    # LayerNorm affine params (torch default: weight=1, bias=0)
    params["g1"] = jnp.ones((1, 512), jnp.float32)
    params["be1"] = jnp.zeros((1, 512), jnp.float32)
    params["g2"] = jnp.ones((1, 256), jnp.float32)
    params["be2"] = jnp.zeros((1, 256), jnp.float32)
    return params


def _reference_forward(params, model_idx, prompt_idx):
    """Pure-JAX f32 reference (weights read back from the stored bf16)."""
    f32 = jnp.float32
    p = jnp.take(params["P"], model_idx, axis=0)
    q = jnp.take(params["Q"], prompt_idx, axis=0)

    def ln(x, g, b):
        mu = jnp.mean(x, axis=-1, keepdims=True)
        var = jnp.mean((x - mu) ** 2, axis=-1, keepdims=True)
        return (x - mu) / jnp.sqrt(var + LN_EPS) * g + b

    q = q @ params["Wt"].astype(f32) + params["bt"]
    h = p * q
    h = jnp.maximum(h @ params["W1"].astype(f32) + params["b1"], 0.0)
    h = ln(h, params["g1"], params["be1"])
    h = jnp.maximum(h @ params["W2"].astype(f32) + params["b2"], 0.0)
    h = ln(h, params["g2"], params["be2"])
    h = jnp.maximum(h @ params["W3"].astype(f32) + params["b3"], 0.0)
    h = jnp.maximum(h @ params["W4"].astype(f32) + params["b4"], 0.0)
    logits = h @ params["Wc"].astype(f32) + params["bc"]
    return logits[:, :params["num_classes"]]


if __name__ == "__main__":
    # Small shapes consistent with the module's forward.
    NUM_MODELS = 5
    NUM_PROMPTS = 16
    MODEL_EMB_DIM = 32
    TEXT_DIM = 128
    NUM_CLASSES = 2
    ALPHA = 0.1
    BATCH = 8

    key = jax.random.PRNGKey(0)
    pkey, ikey1, ikey2, nkey = jax.random.split(key, 4)

    params = init_params(
        pkey,
        num_models=NUM_MODELS,
        num_prompts=NUM_PROMPTS,
        model_embedding_dim=MODEL_EMB_DIM,
        text_dim=TEXT_DIM,
        num_classes=NUM_CLASSES,
    )

    model_idx = jax.random.randint(ikey1, (BATCH,), 0, NUM_MODELS)
    prompt_idx = jax.random.randint(ikey2, (BATCH,), 0, NUM_PROMPTS)

    # Training-mode forward (with gaussian noise on q) and test-mode predict.
    logits_train = textmf_forward(params, model_idx, prompt_idx, alpha=ALPHA,
                                  test_mode=False, noise_key=nkey)
    logits_test = textmf_forward(params, model_idx, prompt_idx, alpha=ALPHA,
                                 test_mode=True)
    preds = textmf_predict(params, model_idx, prompt_idx, alpha=ALPHA)

    jax.block_until_ready((logits_train, logits_test, preds))

    assert logits_train.shape == (BATCH, NUM_CLASSES)
    assert logits_test.shape == (BATCH, NUM_CLASSES)
    assert preds.shape == (BATCH,)
    assert bool(jnp.all(jnp.isfinite(logits_test)))

    # Correctness vs pure-JAX f32 reference (generous tol for bf16 MXU casts).
    ref = _reference_forward(params, model_idx, prompt_idx)
    assert bool(jnp.allclose(logits_test, ref, atol=5e-2, rtol=5e-2))

    print("KERNEL_OK")
</pallas_src>

<mosaic_0001>
module attributes {stable_mosaic.version = 11 : i64} {
  func.func @textmf_kernel(%arg0: i32, %arg1: memref<8x32xf32, #tpu.memory_space<vmem>>, %arg2: memref<8x128xf32, #tpu.memory_space<vmem>>, %arg3: memref<128x32xbf16, #tpu.memory_space<vmem>>, %arg4: memref<1x32xf32, #tpu.memory_space<vmem>>, %arg5: memref<32x512xbf16, #tpu.memory_space<vmem>>, %arg6: memref<1x512xf32, #tpu.memory_space<vmem>>, %arg7: memref<1x512xf32, #tpu.memory_space<vmem>>, %arg8: memref<1x512xf32, #tpu.memory_space<vmem>>, %arg9: memref<512x256xbf16, #tpu.memory_space<vmem>>, %arg10: memref<1x256xf32, #tpu.memory_space<vmem>>, %arg11: memref<1x256xf32, #tpu.memory_space<vmem>>, %arg12: memref<1x256xf32, #tpu.memory_space<vmem>>, %arg13: memref<256x128xbf16, #tpu.memory_space<vmem>>, %arg14: memref<1x128xf32, #tpu.memory_space<vmem>>, %arg15: memref<128x64xbf16, #tpu.memory_space<vmem>>, %arg16: memref<1x64xf32, #tpu.memory_space<vmem>>, %arg17: memref<64x128xbf16, #tpu.memory_space<vmem>>, %arg18: memref<1x128xf32, #tpu.memory_space<vmem>>, %arg19: memref<8x128xf32, #tpu.memory_space<vmem>>) attributes {dimension_semantics = [#tpu.dimension_semantics<parallel>], iteration_bounds = array<i64: 1>, scalar_prefetch = 0 : i64, scratch_operands = 0 : i64, tpu.core_type = #tpu.core_type<tc>, window_params = [{transform_indices = @transform_0, window_bounds = array<i64: 8, 32>}, {transform_indices = @transform_1, window_bounds = array<i64: 8, 128>}, {pipeline_mode = #tpu.pipeline_mode<synchronous>, transform_indices = @transform_2, window_bounds = array<i64: 128, 32>}, {pipeline_mode = #tpu.pipeline_mode<synchronous>, transform_indices = @transform_3, window_bounds = array<i64: 1, 32>}, {pipeline_mode = #tpu.pipeline_mode<synchronous>, transform_indices = @transform_4, window_bounds = array<i64: 32, 512>}, {pipeline_mode = #tpu.pipeline_mode<synchronous>, transform_indices = @transform_5, window_bounds = array<i64: 1, 512>}, {pipeline_mode = #tpu.pipeline_mode<synchronous>, transform_indices = @transform_6, window_bounds = array<i64: 1, 512>}, {pipeline_mode = #tpu.pipeline_mode<synchronous>, transform_indices = @transform_7, window_bounds = array<i64: 1, 512>}, {pipeline_mode = #tpu.pipeline_mode<synchronous>, transform_indices = @transform_8, window_bounds = array<i64: 512, 256>}, {pipeline_mode = #tpu.pipeline_mode<synchronous>, transform_indices = @transform_9, window_bounds = array<i64: 1, 256>}, {pipeline_mode = #tpu.pipeline_mode<synchronous>, transform_indices = @transform_10, window_bounds = array<i64: 1, 256>}, {pipeline_mode = #tpu.pipeline_mode<synchronous>, transform_indices = @transform_11, window_bounds = array<i64: 1, 256>}, {pipeline_mode = #tpu.pipeline_mode<synchronous>, transform_indices = @transform_12, window_bounds = array<i64: 256, 128>}, {pipeline_mode = #tpu.pipeline_mode<synchronous>, transform_indices = @transform_13, window_bounds = array<i64: 1, 128>}, {pipeline_mode = #tpu.pipeline_mode<synchronous>, transform_indices = @transform_14, window_bounds = array<i64: 128, 64>}, {pipeline_mode = #tpu.pipeline_mode<synchronous>, transform_indices = @transform_15, window_bounds = array<i64: 1, 64>}, {pipeline_mode = #tpu.pipeline_mode<synchronous>, transform_indices = @transform_16, window_bounds = array<i64: 64, 128>}, {pipeline_mode = #tpu.pipeline_mode<synchronous>, transform_indices = @transform_17, window_bounds = array<i64: 1, 128>}, {transform_indices = @transform_18, window_bounds = array<i64: 8, 128>}]} {
    %c0 = arith.constant 0 : index
    %c0_0 = arith.constant 0 : index
    %0 = vector.load %arg2[%c0, %c0_0] : memref<8x128xf32, #tpu.memory_space<vmem>>, vector<8x128xf32>
    %1 = arith.truncf %0 : vector<8x128xf32> to vector<8x128xbf16>
    %c0_1 = arith.constant 0 : index
    %c0_2 = arith.constant 0 : index
    %2 = vector.load %arg3[%c0_1, %c0_2] : memref<128x32xbf16, #tpu.memory_space<vmem>>, vector<128x32xbf16>
    %cst = arith.constant dense<0.000000e+00> : vector<8x32xf32>
    %3 = tpu.matmul %1, %2, %cst {dimension_numbers = #tpu.dot_dimension_numbers<[1], [0], [0], [1], [0, 0, 1, 1], [], []>} : vector<8x128xbf16>, vector<128x32xbf16>, vector<8x32xf32> -> vector<8x32xf32>
    %c0_3 = arith.constant 0 : index
    %c0_4 = arith.constant 0 : index
    %4 = vector.load %arg4[%c0_3, %c0_4] : memref<1x32xf32, #tpu.memory_space<vmem>>, vector<1x32xf32>
    %5 = vector.broadcast %4 : vector<1x32xf32> to vector<8x32xf32>
    %6 = arith.addf %3, %5 : vector<8x32xf32>
    %c0_5 = arith.constant 0 : index
    %c0_6 = arith.constant 0 : index
    %7 = vector.load %arg1[%c0_5, %c0_6] : memref<8x32xf32, #tpu.memory_space<vmem>>, vector<8x32xf32>
    %8 = arith.mulf %7, %6 : vector<8x32xf32>
    %9 = arith.truncf %8 : vector<8x32xf32> to vector<8x32xbf16>
    %c0_7 = arith.constant 0 : index
    %c0_8 = arith.constant 0 : index
    %10 = vector.load %arg5[%c0_7, %c0_8] : memref<32x512xbf16, #tpu.memory_space<vmem>>, vector<32x512xbf16>
    %cst_9 = arith.constant dense<0.000000e+00> : vector<8x512xf32>
    %11 = tpu.matmul %9, %10, %cst_9 {dimension_numbers = #tpu.dot_dimension_numbers<[1], [0], [0], [1], [0, 0, 1, 1], [], []>} : vector<8x32xbf16>, vector<32x512xbf16>, vector<8x512xf32> -> vector<8x512xf32>
    %c0_10 = arith.constant 0 : index
    %c0_11 = arith.constant 0 : index
    %12 = vector.load %arg6[%c0_10, %c0_11] : memref<1x512xf32, #tpu.memory_space<vmem>>, vector<1x512xf32>
    %13 = vector.broadcast %12 : vector<1x512xf32> to vector<8x512xf32>
    %14 = arith.addf %11, %13 : vector<8x512xf32>
    %cst_12 = arith.constant 0.000000e+00 : f32
    %15 = vector.broadcast %cst_12 : f32 to vector<8x512xf32>
    %16 = arith.maximumf %14, %15 : vector<8x512xf32>
    %c0_13 = arith.constant 0 : index
    %c0_14 = arith.constant 0 : index
    %17 = vector.load %arg7[%c0_13, %c0_14] : memref<1x512xf32, #tpu.memory_space<vmem>>, vector<1x512xf32>
    %c0_15 = arith.constant 0 : index
    %c0_16 = arith.constant 0 : index
    %18 = vector.load %arg8[%c0_15, %c0_16] : memref<1x512xf32, #tpu.memory_space<vmem>>, vector<1x512xf32>
    %cst_17 = arith.constant dense<0.000000e+00> : vector<8xf32>
    %19 = vector.multi_reduction <add>, %16, %cst_17 [1] : vector<8x512xf32> to vector<8xf32>
    %20 = vector.shape_cast %19 : vector<8xf32> to vector<8x1xf32>
    %21 = arith.mulf %16, %16 : vector<8x512xf32>
    %cst_18 = arith.constant dense<0.000000e+00> : vector<8xf32>
    %22 = vector.multi_reduction <add>, %21, %cst_18 [1] : vector<8x512xf32> to vector<8xf32>
    %23 = vector.shape_cast %22 : vector<8xf32> to vector<8x1xf32>
    %cst_19 = arith.constant 0.001953125 : f32
    %24 = vector.broadcast %cst_19 : f32 to vector<8x1xf32>
    %25 = arith.mulf %20, %24 : vector<8x1xf32>
    %cst_20 = arith.constant 0.001953125 : f32
    %26 = vector.broadcast %cst_20 : f32 to vector<8x1xf32>
    %27 = arith.mulf %23, %26 : vector<8x1xf32>
    %28 = arith.mulf %25, %25 : vector<8x1xf32>
    %29 = arith.subf %27, %28 : vector<8x1xf32>
    %cst_21 = arith.constant 0.000000e+00 : f32
    %30 = vector.broadcast %cst_21 : f32 to vector<8x1xf32>
    %31 = arith.maximumf %29, %30 : vector<8x1xf32>
    %32 = vector.broadcast %25 : vector<8x1xf32> to vector<8x512xf32>
    %33 = arith.subf %16, %32 : vector<8x512xf32>
    %cst_22 = arith.constant 9.99999974E-6 : f32
    %34 = vector.broadcast %cst_22 : f32 to vector<8x1xf32>
    %35 = arith.addf %31, %34 : vector<8x1xf32>
    %36 = math.rsqrt %35 : vector<8x1xf32>
    %37 = vector.broadcast %36 : vector<8x1xf32> to vector<8x512xf32>
    %38 = arith.mulf %33, %37 : vector<8x512xf32>
    %39 = vector.broadcast %17 : vector<1x512xf32> to vector<8x512xf32>
    %40 = arith.mulf %38, %39 : vector<8x512xf32>
    %41 = vector.broadcast %18 : vector<1x512xf32> to vector<8x512xf32>
    %42 = arith.addf %40, %41 : vector<8x512xf32>
    %43 = arith.truncf %42 : vector<8x512xf32> to vector<8x512xbf16>
    %c0_23 = arith.constant 0 : index
    %c0_24 = arith.constant 0 : index
    %44 = vector.load %arg9[%c0_23, %c0_24] : memref<512x256xbf16, #tpu.memory_space<vmem>>, vector<512x256xbf16>
    %cst_25 = arith.constant dense<0.000000e+00> : vector<8x256xf32>
    %45 = tpu.matmul %43, %44, %cst_25 {dimension_numbers = #tpu.dot_dimension_numbers<[1], [0], [0], [1], [0, 0, 1, 1], [], []>} : vector<8x512xbf16>, vector<512x256xbf16>, vector<8x256xf32> -> vector<8x256xf32>
    %c0_26 = arith.constant 0 : index
    %c0_27 = arith.constant 0 : index
    %46 = vector.load %arg10[%c0_26, %c0_27] : memref<1x256xf32, #tpu.memory_space<vmem>>, vector<1x256xf32>
    %47 = vector.broadcast %46 : vector<1x256xf32> to vector<8x256xf32>
    %48 = arith.addf %45, %47 : vector<8x256xf32>
    %cst_28 = arith.constant 0.000000e+00 : f32
    %49 = vector.broadcast %cst_28 : f32 to vector<8x256xf32>
    %50 = arith.maximumf %48, %49 : vector<8x256xf32>
    %c0_29 = arith.constant 0 : index
    %c0_30 = arith.constant 0 : index
    %51 = vector.load %arg11[%c0_29, %c0_30] : memref<1x256xf32, #tpu.memory_space<vmem>>, vector<1x256xf32>
    %c0_31 = arith.constant 0 : index
    %c0_32 = arith.constant 0 : index
    %52 = vector.load %arg12[%c0_31, %c0_32] : memref<1x256xf32, #tpu.memory_space<vmem>>, vector<1x256xf32>
    %cst_33 = arith.constant dense<0.000000e+00> : vector<8xf32>
    %53 = vector.multi_reduction <add>, %50, %cst_33 [1] : vector<8x256xf32> to vector<8xf32>
    %54 = vector.shape_cast %53 : vector<8xf32> to vector<8x1xf32>
    %55 = arith.mulf %50, %50 : vector<8x256xf32>
    %cst_34 = arith.constant dense<0.000000e+00> : vector<8xf32>
    %56 = vector.multi_reduction <add>, %55, %cst_34 [1] : vector<8x256xf32> to vector<8xf32>
    %57 = vector.shape_cast %56 : vector<8xf32> to vector<8x1xf32>
    %cst_35 = arith.constant 3.906250e-03 : f32
    %58 = vector.broadcast %cst_35 : f32 to vector<8x1xf32>
    %59 = arith.mulf %54, %58 : vector<8x1xf32>
    %cst_36 = arith.constant 3.906250e-03 : f32
    %60 = vector.broadcast %cst_36 : f32 to vector<8x1xf32>
    %61 = arith.mulf %57, %60 : vector<8x1xf32>
    %62 = arith.mulf %59, %59 : vector<8x1xf32>
    %63 = arith.subf %61, %62 : vector<8x1xf32>
    %cst_37 = arith.constant 0.000000e+00 : f32
    %64 = vector.broadcast %cst_37 : f32 to vector<8x1xf32>
    %65 = arith.maximumf %63, %64 : vector<8x1xf32>
    %66 = vector.broadcast %59 : vector<8x1xf32> to vector<8x256xf32>
    %67 = arith.subf %50, %66 : vector<8x256xf32>
    %cst_38 = arith.constant 9.99999974E-6 : f32
    %68 = vector.broadcast %cst_38 : f32 to vector<8x1xf32>
    %69 = arith.addf %65, %68 : vector<8x1xf32>
    %70 = math.rsqrt %69 : vector<8x1xf32>
    %71 = vector.broadcast %70 : vector<8x1xf32> to vector<8x256xf32>
    %72 = arith.mulf %67, %71 : vector<8x256xf32>
    %73 = vector.broadcast %51 : vector<1x256xf32> to vector<8x256xf32>
    %74 = arith.mulf %72, %73 : vector<8x256xf32>
    %75 = vector.broadcast %52 : vector<1x256xf32> to vector<8x256xf32>
    %76 = arith.addf %74, %75 : vector<8x256xf32>
    %77 = arith.truncf %76 : vector<8x256xf32> to vector<8x256xbf16>
    %c0_39 = arith.constant 0 : index
    %c0_40 = arith.constant 0 : index
    %78 = vector.load %arg13[%c0_39, %c0_40] : memref<256x128xbf16, #tpu.memory_space<vmem>>, vector<256x128xbf16>
    %cst_41 = arith.constant dense<0.000000e+00> : vector<8x128xf32>
    %79 = tpu.matmul %77, %78, %cst_41 {dimension_numbers = #tpu.dot_dimension_numbers<[1], [0], [0], [1], [0, 0, 1, 1], [], []>} : vector<8x256xbf16>, vector<256x128xbf16>, vector<8x128xf32> -> vector<8x128xf32>
    %c0_42 = arith.constant 0 : index
    %c0_43 = arith.constant 0 : index
    %80 = vector.load %arg14[%c0_42, %c0_43] : memref<1x128xf32, #tpu.memory_space<vmem>>, vector<1x128xf32>
    %81 = vector.broadcast %80 : vector<1x128xf32> to vector<8x128xf32>
    %82 = arith.addf %79, %81 : vector<8x128xf32>
    %cst_44 = arith.constant 0.000000e+00 : f32
    %83 = vector.broadcast %cst_44 : f32 to vector<8x128xf32>
    %84 = arith.maximumf %82, %83 : vector<8x128xf32>
    %85 = arith.truncf %84 : vector<8x128xf32> to vector<8x128xbf16>
    %c0_45 = arith.constant 0 : index
    %c0_46 = arith.constant 0 : index
    %86 = vector.load %arg15[%c0_45, %c0_46] : memref<128x64xbf16, #tpu.memory_space<vmem>>, vector<128x64xbf16>
    %cst_47 = arith.constant dense<0.000000e+00> : vector<8x64xf32>
    %87 = tpu.matmul %85, %86, %cst_47 {dimension_numbers = #tpu.dot_dimension_numbers<[1], [0], [0], [1], [0, 0, 1, 1], [], []>} : vector<8x128xbf16>, vector<128x64xbf16>, vector<8x64xf32> -> vector<8x64xf32>
    %c0_48 = arith.constant 0 : index
    %c0_49 = arith.constant 0 : index
    %88 = vector.load %arg16[%c0_48, %c0_49] : memref<1x64xf32, #tpu.memory_space<vmem>>, vector<1x64xf32>
    %89 = vector.broadcast %88 : vector<1x64xf32> to vector<8x64xf32>
    %90 = arith.addf %87, %89 : vector<8x64xf32>
    %cst_50 = arith.constant 0.000000e+00 : f32
    %91 = vector.broadcast %cst_50 : f32 to vector<8x64xf32>
    %92 = arith.maximumf %90, %91 : vector<8x64xf32>
    %93 = arith.truncf %92 : vector<8x64xf32> to vector<8x64xbf16>
    %c0_51 = arith.constant 0 : index
    %c0_52 = arith.constant 0 : index
    %94 = vector.load %arg17[%c0_51, %c0_52] : memref<64x128xbf16, #tpu.memory_space<vmem>>, vector<64x128xbf16>
    %cst_53 = arith.constant dense<0.000000e+00> : vector<8x128xf32>
    %95 = tpu.matmul %93, %94, %cst_53 {dimension_numbers = #tpu.dot_dimension_numbers<[1], [0], [0], [1], [0, 0, 1, 1], [], []>} : vector<8x64xbf16>, vector<64x128xbf16>, vector<8x128xf32> -> vector<8x128xf32>
    %c0_54 = arith.constant 0 : index
    %c0_55 = arith.constant 0 : index
    %96 = vector.load %arg18[%c0_54, %c0_55] : memref<1x128xf32, #tpu.memory_space<vmem>>, vector<1x128xf32>
    %97 = vector.broadcast %96 : vector<1x128xf32> to vector<8x128xf32>
    %98 = arith.addf %95, %97 : vector<8x128xf32>
    %c0_56 = arith.constant 0 : index
    %c0_57 = arith.constant 0 : index
    %99 = vector.load %arg19[%c0_56, %c0_57] : memref<8x128xf32, #tpu.memory_space<vmem>>, vector<8x128xf32>
    tpu.vector_store %arg19[%c0_56, %c0_57], %98 {strides = array<i32>} : memref<8x128xf32, #tpu.memory_space<vmem>>, vector<8x128xf32>,
    return
  }
  func.func @transform_0(%arg0: i32) -> (i32, i32) {
    %c0_i32 = arith.constant 0 : i32
    %c0_i32_0 = arith.constant 0 : i32
    return %arg0, %c0_i32 : i32, i32
  }
  func.func @transform_1(%arg0: i32) -> (i32, i32) {
    %c0_i32 = arith.constant 0 : i32
    %c0_i32_0 = arith.constant 0 : i32
    return %arg0, %c0_i32 : i32, i32
  }
  func.func @transform_2(%arg0: i32) -> (i32, i32) {
    %c0_i32 = arith.constant 0 : i32
    %c0_i32_0 = arith.constant 0 : i32
    %c0_i32_1 = arith.constant 0 : i32
    return %c0_i32, %c0_i32_0 : i32, i32
  }
  func.func @transform_3(%arg0: i32) -> (i32, i32) {
    %c0_i32 = arith.constant 0 : i32
    %c0_i32_0 = arith.constant 0 : i32
    %c0_i32_1 = arith.constant 0 : i32
    return %c0_i32, %c0_i32_0 : i32, i32
  }
  func.func @transform_4(%arg0: i32) -> (i32, i32) {
    %c0_i32 = arith.constant 0 : i32
    %c0_i32_0 = arith.constant 0 : i32
    %c0_i32_1 = arith.constant 0 : i32
    return %c0_i32, %c0_i32_0 : i32, i32
  }
  func.func @transform_5(%arg0: i32) -> (i32, i32) {
    %c0_i32 = arith.constant 0 : i32
    %c0_i32_0 = arith.constant 0 : i32
    %c0_i32_1 = arith.constant 0 : i32
    return %c0_i32, %c0_i32_0 : i32, i32
  }
  func.func @transform_6(%arg0: i32) -> (i32, i32) {
    %c0_i32 = arith.constant 0 : i32
    %c0_i32_0 = arith.constant 0 : i32
    %c0_i32_1 = arith.constant 0 : i32
    return %c0_i32, %c0_i32_0 : i32, i32
  }
  func.func @transform_7(%arg0: i32) -> (i32, i32) {
    %c0_i32 = arith.constant 0 : i32
    %c0_i32_0 = arith.constant 0 : i32
    %c0_i32_1 = arith.constant 0 : i32
    return %c0_i32, %c0_i32_0 : i32, i32
  }
  func.func @transform_8(%arg0: i32) -> (i32, i32) {
    %c0_i32 = arith.constant 0 : i32
    %c0_i32_0 = arith.constant 0 : i32
    %c0_i32_1 = arith.constant 0 : i32
    return %c0_i32, %c0_i32_0 : i32, i32
  }
  func.func @transform_9(%arg0: i32) -> (i32, i32) {
    %c0_i32 = arith.constant 0 : i32
    %c0_i32_0 = arith.constant 0 : i32
    %c0_i32_1 = arith.constant 0 : i32
    return %c0_i32, %c0_i32_0 : i32, i32
  }
  func.func @transform_10(%arg0: i32) -> (i32, i32) {
    %c0_i32 = arith.constant 0 : i32
    %c0_i32_0 = arith.constant 0 : i32
    %c0_i32_1 = arith.constant 0 : i32
    return %c0_i32, %c0_i32_0 : i32, i32
  }
  func.func @transform_11(%arg0: i32) -> (i32, i32) {
    %c0_i32 = arith.constant 0 : i32
    %c0_i32_0 = arith.constant 0 : i32
    %c0_i32_1 = arith.constant 0 : i32
    return %c0_i32, %c0_i32_0 : i32, i32
  }
  func.func @transform_12(%arg0: i32) -> (i32, i32) {
    %c0_i32 = arith.constant 0 : i32
    %c0_i32_0 = arith.constant 0 : i32
    %c0_i32_1 = arith.constant 0 : i32
    return %c0_i32, %c0_i32_0 : i32, i32
  }
  func.func @transform_13(%arg0: i32) -> (i32, i32) {
    %c0_i32 = arith.constant 0 : i32
    %c0_i32_0 = arith.constant 0 : i32
    %c0_i32_1 = arith.constant 0 : i32
    return %c0_i32, %c0_i32_0 : i32, i32
  }
  func.func @transform_14(%arg0: i32) -> (i32, i32) {
    %c0_i32 = arith.constant 0 : i32
    %c0_i32_0 = arith.constant 0 : i32
    %c0_i32_1 = arith.constant 0 : i32
    return %c0_i32, %c0_i32_0 : i32, i32
  }
  func.func @transform_15(%arg0: i32) -> (i32, i32) {
    %c0_i32 = arith.constant 0 : i32
    %c0_i32_0 = arith.constant 0 : i32
    %c0_i32_1 = arith.constant 0 : i32
    return %c0_i32, %c0_i32_0 : i32, i32
  }
  func.func @transform_16(%arg0: i32) -> (i32, i32) {
    %c0_i32 = arith.constant 0 : i32
    %c0_i32_0 = arith.constant 0 : i32
    %c0_i32_1 = arith.constant 0 : i32
    return %c0_i32, %c0_i32_0 : i32, i32
  }
  func.func @transform_17(%arg0: i32) -> (i32, i32) {
    %c0_i32 = arith.constant 0 : i32
    %c0_i32_0 = arith.constant 0 : i32
    %c0_i32_1 = arith.constant 0 : i32
    return %c0_i32, %c0_i32_0 : i32, i32
  }
  func.func @transform_18(%arg0: i32) -> (i32, i32) {
    %c0_i32 = arith.constant 0 : i32
    %c0_i32_0 = arith.constant 0 : i32
    return %arg0, %c0_i32 : i32, i32
  }
}

</mosaic_0001>

<bundles_post_ra>
// kernel: tpu_custom_call.1
= control target key start
LH: loop header
LB: loop body
LE: loop exit
PB: predicated region body
PF: predicated region fallthrough
CT: control target
= control target key end

     0   :  { %s2853_s0 = inlined_call_operand.hbm [shape: f32[8,32], index: 0, kind: input, shape index: {}]   ;;  %s2854_s1 = inlined_call_operand.hbm [shape: f32[8,128], index: 1, kind: input, shape index: {}]   ;;  %s2855_s2 = inlined_call_operand.hbm [shape: bf16[128,32], index: 2, kind: input, shape index: {}]   ;;  %s2856_s3 = inlined_call_operand.hbm [shape: f32[1,32], index: 3, kind: input, shape index: {}]   ;;  %s2857_s4 = inlined_call_operand.hbm [shape: bf16[32,512], index: 4, kind: input, shape index: {}]   ;;  %s2858_s5 = inlined_call_operand.hbm [shape: f32[1,512], index: 5, kind: input, shape index: {}]   ;;  %s2859_s6 = inlined_call_operand.hbm [shape: f32[1,512], index: 6, kind: input, shape index: {}]   ;;  %s2860_s7 = inlined_call_operand.hbm [shape: f32[1,512], index: 7, kind: input, shape index: {}]   ;;  %s2861_s8 = inlined_call_operand.hbm [shape: bf16[512,256], index: 8, kind: input, shape index: {}]   ;;  %s2862_s9 = inlined_call_operand.hbm [shape: f32[1,256], index: 9, kind: input, shape index: {}]   ;;  %s2863_s10 = inlined_call_operand.hbm [shape: f32[1,256], index: 10, kind: input, shape index: {}]   ;;  %s2864_s11 = inlined_call_operand.hbm [shape: f32[1,256], index: 11, kind: input, shape index: {}]   ;;  %s2865_s12 = inlined_call_operand.hbm [shape: bf16[256,128], index: 12, kind: input, shape index: {}]   ;;  %s2866_s13 = inlined_call_operand.hbm [shape: f32[1,128], index: 13, kind: input, shape index: {}]   ;;  %s2867_s14 = inlined_call_operand.hbm [shape: bf16[128,64], index: 14, kind: input, shape index: {}]   ;;  %s2868_s15 = inlined_call_operand.hbm [shape: f32[1,64], index: 15, kind: input, shape index: {}]   ;;  %s2869_s16 = inlined_call_operand.hbm [shape: bf16[64,128], index: 16, kind: input, shape index: {}]   ;;  %s2870_s17 = inlined_call_operand.hbm [shape: f32[1,128], index: 17, kind: input, shape index: {}]   ;;  %s2871_s18 = inlined_call_operand.hbm [shape: f32[8,128], index: 18, kind: output, shape index: {}]  }
   0x1   :  { %2875 = sst [smem:[#allocation43_spill]] %s2853_s0 }
   0x2   :  { %2876 = sst [smem:[#allocation44_spill]] %s2854_s1 }
   0x3   :  { %2877 = sst [smem:[#allocation45_spill]] %s2855_s2 }
   0x4   :  { %23 = vsyncpa [#allocation3], 0 }
   0x5   :  { %24 = vsyncpa [#allocation6], 0 }
   0x6   :  { %25 = vsyncpa [#allocation9], 0 }
   0x7   :  { %26 = vsyncpa [#allocation12], 0 }
   0x8   :  { %27 = vsyncpa [#allocation15], 0 }
   0x9   :  { %28 = vsyncpa [#allocation18], 0 }
   0xa   :  { %29 = vsyncpa [#allocation21], 0 }
   0xb   :  { %30 = vsyncpa [#allocation24], 0 }
   0xc   :  { %31 = vsyncpa [#allocation27], 0 }
   0xd   :  { %32 = vsyncpa [#allocation30], 0 }
   0xe   :  { %33 = vsyncpa [#allocation4], 0  ;;  %s2403_s27 = smov [#allocation5]   ;;  %s2404_s29 = smov [#allocation8]  }
   0xf   :  { %s50_s28 = sshll.u32 %s2403_s27, 4  ;;  %s72_s30 = sshll.u32 %s2404_s29, 4  ;;  %s51_s28 = int_to_ptr.vmem [resolvable:$true] %s50_s28  ;;  %s73_s30 = int_to_ptr.vmem [resolvable:$true] %s72_s30 }
  0x10   :  { %s2878_s1 = sld [smem:[#allocation44_spill]] }
  0x16   :  { %s1963_s20 = scalar_lea.hbm %s2878_s1, 128 }
  0x17   :  { %p1964_p0 = scmp.ne.s32.totalorder %s2878_s1, %s1963_s20  ;;  %p1967_p1 = scmp.lt.u32.totalorder %s1963_s20, %s2878_s1 }
  0x19   :  { %p1969_p2 = pnand %p1967_p1, %p1964_p0 }
  0x1b   :  { %1972 = shalt.err (!%p1969_p2)
}
  0x1c   :  { %s1973_s24 = scalar_lea.vmem %s51_s28, 128  ;;  %p1978_p4 = scmp.lt.s32.totalorder %s51_s28, %s51_s28 }
  0x1d   :  { %p1974_p3 = scmp.ne.s32.totalorder %s51_s28, %s1973_s24  ;;  %p1979_p5 = scmp.lt.s32.totalorder %s1973_s24, %s1973_s24 }
  0x1f   :  { %p1980_p6 = por %p1979_p5, %p1978_p4 }
  0x21   :  { %p1981_p7 = pnand %p1980_p6, %p1974_p3 }
  0x23   :  { %1984 = shalt.err (!%p1981_p7)
}
  0x24   :  { %53 = dma.hbm_to_vmem [thread:$0]  %s2878_s1, 128, %s51_s28, [#allocation6]  }
  0x25   :  { %s1985_s0 = scalar_lea.hbm %s2856_s3, 16 }
  0x26   :  { %p1986_p8 = scmp.ne.s32.totalorder %s2856_s3, %s1985_s0  ;;  %p1989_p9 = scmp.lt.u32.totalorder %s1985_s0, %s2856_s3 }
  0x28   :  { %p1991_p10 = pnand %p1989_p9, %p1986_p8 }
  0x2a   :  { %1994 = shalt.err (!%p1991_p10)
}
  0x2b   :  { %s1995_s2 = scalar_lea.vmem %s73_s30, 16  ;;  %s1999_s23 = scalar_lea.vmem %s73_s30, 32 }
  0x2c   :  { %p1996_p11 = scmp.ne.s32.totalorder %s73_s30, %s1995_s2  ;;  %p2000_p12 = scmp.lt.s32.totalorder %s73_s30, %s73_s30 }
  0x2d   :  { %p2001_p13 = scmp.lt.s32.totalorder %s1999_s23, %s1995_s2 }
  0x2f   :  { %p2002_p0 = por %p2001_p13, %p2000_p12 }
  0x31   :  { %p2003_p1 = pnand %p2002_p0, %p1996_p11 }
  0x33   :  { %2006 = shalt.err (!%p2003_p1)
}
  0x34   :  { %75 = dma.hbm_to_vmem [thread:$0]  %s2856_s3, 16, %s73_s30, [#allocation9]  }
  0x35   :  { %s2405_s24 = smov [#allocation11]   ;;  %s2406_s26 = smov [#allocation14]  }
  0x36   :  { %s94_s25 = sshll.u32 %s2405_s24, 4  ;;  %s114_s27 = sshll.u32 %s2406_s26, 4  ;;  %s95_s25 = int_to_ptr.vmem [resolvable:$true] %s94_s25  ;;  %s115_s27 = int_to_ptr.vmem [resolvable:$true] %s114_s27 }
  0x37   :  { %s2007_s19 = scalar_lea.hbm %s2858_s5, 64 }
  0x38   :  { %p2008_p2 = scmp.ne.s32.totalorder %s2858_s5, %s2007_s19  ;;  %p2011_p3 = scmp.lt.u32.totalorder %s2007_s19, %s2858_s5 }
  0x3a   :  { %p2013_p4 = pnand %p2011_p3, %p2008_p2 }
  0x3c   :  { %2016 = shalt.err (!%p2013_p4)
}
  0x3d   :  { %s2017_s3 = scalar_lea.vmem %s95_s25, 64  ;;  %p2022_p6 = scmp.lt.s32.totalorder %s95_s25, %s95_s25 }
  0x3e   :  { %p2018_p5 = scmp.ne.s32.totalorder %s95_s25, %s2017_s3  ;;  %p2023_p7 = scmp.lt.s32.totalorder %s2017_s3, %s2017_s3 }
  0x40   :  { %p2024_p8 = por %p2023_p7, %p2022_p6 }
  0x42   :  { %p2025_p9 = pnand %p2024_p8, %p2018_p5 }
  0x44   :  { %2028 = shalt.err (!%p2025_p9)
}
  0x45   :  { %97 = dma.hbm_to_vmem [thread:$0]  %s2858_s5, 64, %s95_s25, [#allocation12]  }
  0x46   :  { %s2029_s24 = scalar_lea.hbm %s2860_s7, 64 }
  0x47   :  { %p2030_p10 = scmp.ne.s32.totalorder %s2860_s7, %s2029_s24  ;;  %p2033_p11 = scmp.lt.u32.totalorder %s2029_s24, %s2860_s7 }
  0x49   :  { %p2035_p12 = pnand %p2033_p11, %p2030_p10 }
  0x4b   :  { %2038 = shalt.err (!%p2035_p12)
}
  0x4c   :  { %s2039_s21 = scalar_lea.vmem %s115_s27, 64  ;;  %p2044_p0 = scmp.lt.s32.totalorder %s115_s27, %s115_s27 }
  0x4d   :  { %p2040_p13 = scmp.ne.s32.totalorder %s115_s27, %s2039_s21  ;;  %p2045_p1 = scmp.lt.s32.totalorder %s2039_s21, %s2039_s21 }
  0x4f   :  { %p2046_p2 = por %p2045_p1, %p2044_p0 }
  0x51   :  { %p2047_p3 = pnand %p2046_p2, %p2040_p13 }
  0x53   :  { %2050 = shalt.err (!%p2047_p3)
}
  0x54   :  { %117 = dma.hbm_to_vmem [thread:$0]  %s2860_s7, 64, %s115_s27, [#allocation15]  }
  0x55   :  { %s2407_s20 = smov [#allocation17]   ;;  %s2408_s2 = smov [#allocation20]  }
  0x56   :  { %s136_s22 = sshll.u32 %s2407_s20, 4  ;;  %s156_s3 = sshll.u32 %s2408_s2, 4  ;;  %s137_s22 = int_to_ptr.vmem [resolvable:$true] %s136_s22  ;;  %s157_s3 = int_to_ptr.vmem [resolvable:$true] %s156_s3 }
  0x57   :  { %s2051_s28 = scalar_lea.hbm %s2862_s9, 32 }
  0x58   :  { %p2052_p4 = scmp.ne.s32.totalorder %s2862_s9, %s2051_s28  ;;  %p2055_p5 = scmp.lt.u32.totalorder %s2051_s28, %s2862_s9 }
  0x5a   :  { %p2057_p6 = pnand %p2055_p5, %p2052_p4 }
  0x5c   :  { %2060 = shalt.err (!%p2057_p6)
}
  0x5d   :  { %s2061_s7 = scalar_lea.vmem %s137_s22, 32  ;;  %p2066_p8 = scmp.lt.s32.totalorder %s137_s22, %s137_s22 }
  0x5e   :  { %p2062_p7 = scmp.ne.s32.totalorder %s137_s22, %s2061_s7  ;;  %p2067_p9 = scmp.lt.s32.totalorder %s2061_s7, %s2061_s7 }
  0x60   :  { %p2068_p10 = por %p2067_p9, %p2066_p8 }
  0x62   :  { %p2069_p11 = pnand %p2068_p10, %p2062_p7 }
  0x64   :  { %2072 = shalt.err (!%p2069_p11)
}
  0x65   :  { %139 = dma.hbm_to_vmem [thread:$0]  %s2862_s9, 32, %s137_s22, [#allocation18]  }
  0x66   :  { %s2073_s5 = scalar_lea.hbm %s2864_s11, 32 }
  0x67   :  { %p2074_p12 = scmp.ne.s32.totalorder %s2864_s11, %s2073_s5  ;;  %p2077_p13 = scmp.lt.u32.totalorder %s2073_s5, %s2864_s11 }
  0x69   :  { %p2079_p0 = pnand %p2077_p13, %p2074_p12 }
  0x6b   :  { %2082 = shalt.err (!%p2079_p0)
}
  0x6c   :  { %s2083_s23 = scalar_lea.vmem %s157_s3, 32  ;;  %p2088_p2 = scmp.lt.s32.totalorder %s157_s3, %s157_s3 }
  0x6d   :  { %p2084_p1 = scmp.ne.s32.totalorder %s157_s3, %s2083_s23  ;;  %p2089_p3 = scmp.lt.s32.totalorder %s2083_s23, %s2083_s23 }
  0x6f   :  { %p2090_p4 = por %p2089_p3, %p2088_p2 }
  0x71   :  { %p2091_p5 = pnand %p2090_p4, %p2084_p1 }
  0x73   :  { %2094 = shalt.err (!%p2091_p5)
}
  0x74   :  { %159 = dma.hbm_to_vmem [thread:$0]  %s2864_s11, 32, %s157_s3, [#allocation21]  }
  0x75   :  { %s2409_s28 = smov [#allocation23]   ;;  %s2410_s24 = smov [#allocation26]  }
  0x76   :  { %s178_s1 = sshll.u32 %s2409_s28, 4  ;;  %s200_s26 = sshll.u32 %s2410_s24, 4  ;;  %s179_s1 = int_to_ptr.vmem [resolvable:$true] %s178_s1  ;;  %s201_s26 = int_to_ptr.vmem [resolvable:$true] %s200_s26 }
  0x77   :  { %s2095_s27 = scalar_lea.hbm %s2866_s13, 16 }
  0x78   :  { %p2096_p6 = scmp.ne.s32.totalorder %s2866_s13, %s2095_s27  ;;  %p2099_p7 = scmp.lt.u32.totalorder %s2095_s27, %s2866_s13 }
  0x7a   :  { %p2101_p8 = pnand %p2099_p7, %p2096_p6 }
  0x7c   :  { %2104 = shalt.err (!%p2101_p8)
}
  0x7d   :  { %s2105_s11 = scalar_lea.vmem %s179_s1, 16  ;;  %s2109_s3 = scalar_lea.vmem %s179_s1, 32 }
  0x7e   :  { %p2106_p9 = scmp.ne.s32.totalorder %s179_s1, %s2105_s11  ;;  %p2110_p10 = scmp.lt.s32.totalorder %s179_s1, %s179_s1 }
  0x7f   :  { %p2111_p11 = scmp.lt.s32.totalorder %s2109_s3, %s2105_s11 }
  0x81   :  { %p2112_p12 = por %p2111_p11, %p2110_p10 }
  0x83   :  { %p2113_p13 = pnand %p2112_p12, %p2106_p9 }
  0x85   :  { %2116 = shalt.err (!%p2113_p13)
}
  0x86   :  { %181 = dma.hbm_to_vmem [thread:$0]  %s2866_s13, 16, %s179_s1, [#allocation24]  }
  0x87   :  { %s2117_s23 = scalar_lea.hbm %s2868_s15, 16 }
  0x88   :  { %p2118_p0 = scmp.ne.s32.totalorder %s2868_s15, %s2117_s23  ;;  %p2121_p1 = scmp.lt.u32.totalorder %s2117_s23, %s2868_s15 }
  0x8a   :  { %p2123_p2 = pnand %p2121_p1, %p2118_p0 }
  0x8c   :  { %2126 = shalt.err (!%p2123_p2)
}
  0x8d   :  { %s2127_s29 = scalar_lea.vmem %s201_s26, 16  ;;  %s2131_s7 = scalar_lea.vmem %s201_s26, 32 }
  0x8e   :  { %p2128_p3 = scmp.ne.s32.totalorder %s201_s26, %s2127_s29  ;;  %p2132_p4 = scmp.lt.s32.totalorder %s201_s26, %s201_s26 }
  0x8f   :  { %p2133_p5 = scmp.lt.s32.totalorder %s2131_s7, %s2127_s29 }
  0x91   :  { %p2134_p6 = por %p2133_p5, %p2132_p4 }
  0x93   :  { %p2135_p7 = pnand %p2134_p6, %p2128_p3 }
  0x95   :  { %2138 = shalt.err (!%p2135_p7)
}
  0x96   :  { %203 = dma.hbm_to_vmem [thread:$0]  %s2868_s15, 16, %s201_s26, [#allocation27]  }
  0x97   :  { %s2411_s27 = smov [#allocation2]   ;;  %s2412_s19 = smov [#allocation7]  }
  0x98   :  { %s40_s0 = sshll.u32 %s2411_s27, 4  ;;  %s59_s21 = sshll.u32 %s2412_s19, 4  ;;  %s41_s0 = int_to_ptr.vmem [resolvable:$true] %s40_s0  ;;  %s2622_s21 = int_to_ptr.vmem [resolvable:$true] %s59_s21 }
  0x99   :  { %s2879_s3 = sld [smem:[#allocation43_spill]] }
  0x9f   :  { %s2139_s25 = scalar_lea.hbm %s2879_s3, 128 }
  0xa0   :  { %p2140_p8 = scmp.ne.s32.totalorder %s2879_s3, %s2139_s25  ;;  %p2143_p9 = scmp.lt.u32.totalorder %s2139_s25, %s2879_s3 }
  0xa2   :  { %p2145_p10 = pnand %p2143_p9, %p2140_p8 }
  0xa4   :  { %2148 = shalt.err (!%p2145_p10)
}
  0xa5   :  { %s2149_s15 = scalar_lea.vmem %s41_s0, 128  ;;  %p2154_p12 = scmp.lt.s32.totalorder %s41_s0, %s41_s0 }
  0xa6   :  { %p2150_p11 = scmp.ne.s32.totalorder %s41_s0, %s2149_s15  ;;  %p2155_p13 = scmp.lt.s32.totalorder %s2149_s15, %s2149_s15 }
  0xa8   :  { %p2156_p0 = por %p2155_p13, %p2154_p12 }
  0xaa   :  { %p2157_p1 = pnand %p2156_p0, %p2150_p11 }
  0xac   :  { %2160 = shalt.err (!%p2157_p1)
}
  0xad   :  { %43 = dma.hbm_to_vmem [thread:$0]  %s2879_s3, 128, %s41_s0, [#allocation3]  }
  0xae   :  { %s2880_s24 = sld [smem:[#allocation45_spill]] }
  0xb4   :  { %s2161_s29 = scalar_lea.hbm %s2880_s24, 1024 }
  0xb5   :  { %p2162_p2 = scmp.ne.s32.totalorder %s2880_s24, %s2161_s29  ;;  %p2165_p3 = scmp.lt.u32.totalorder %s2161_s29, %s2880_s24 }
  0xb7   :  { %p2167_p4 = pnand %p2165_p3, %p2162_p2 }
  0xb9   :  { %2170 = shalt.err (!%p2167_p4)
}
  0xba   :  { %s2171_s19 = scalar_lea.vmem %s2622_s21, 1024  ;;  %p2176_p6 = scmp.lt.s32.totalorder %s2622_s21, %s2622_s21 }
  0xbb   :  { %p2172_p5 = scmp.ne.s32.totalorder %s2622_s21, %s2171_s19  ;;  %p2177_p7 = scmp.lt.s32.totalorder %s2171_s19, %s2171_s19 }
  0xbd   :  { %p2178_p8 = por %p2177_p7, %p2176_p6 }
  0xbf   :  { %p2179_p9 = pnand %p2178_p8, %p2172_p5 }
  0xc1   :  { %2182 = shalt.err (!%p2179_p9)
}
  0xc2   :  { %s2413_s0 = smov 64   ;;  %s2414_s5 = smov 4  }
  0xc3   :  { %65 = dma.hbm_to_vmem [thread:$0]  %s2880_s24, 1024, %s2622_s21, [#allocation6], %s2413_s0, %s2413_s0, %s2414_s5  }
  0xc4   :  { %s2415_s25 = smov [#allocation10]   ;;  %s2183_s23 = scalar_lea.hbm %s2857_s4, 1024 }
  0xc5   :  { %s81_s20 = sshll.u32 %s2415_s25, 4  ;;  %p2184_p10 = scmp.ne.s32.totalorder %s2857_s4, %s2183_s23  ;;  %s82_s20 = int_to_ptr.vmem [resolvable:$true] %s81_s20 }
  0xc6   :  { %p2187_p11 = scmp.lt.u32.totalorder %s2183_s23, %s2857_s4 }
  0xc8   :  { %p2189_p12 = pnand %p2187_p11, %p2184_p10 }
  0xca   :  { %2192 = shalt.err (!%p2189_p12)
}
  0xcb   :  { %s2193_s28 = scalar_lea.vmem %s82_s20, 1024  ;;  %p2198_p0 = scmp.lt.s32.totalorder %s82_s20, %s82_s20 }
  0xcc   :  { %p2194_p13 = scmp.ne.s32.totalorder %s82_s20, %s2193_s28  ;;  %p2199_p1 = scmp.lt.s32.totalorder %s2193_s28, %s2193_s28 }
  0xce   :  { %p2200_p2 = por %p2199_p1, %p2198_p0 }
  0xd0   :  { %p2201_p3 = pnand %p2200_p2, %p2194_p13 }
  0xd2   :  { %2204 = shalt.err (!%p2201_p3)
}
  0xd3   :  { %s2416_s21 = smov 256   ;;  %s2417_s24 = smov 16  }
  0xd4   :  { %87 = dma.hbm_to_vmem [thread:$0]  %s2857_s4, 1024, %s82_s20, [#allocation9], %s2416_s21, %s2416_s21, %s2417_s24  }
  0xd5   :  { %s2418_s13 = smov [#allocation13]   ;;  %s2419_s27 = smov [#allocation16]  }
  0xd6   :  { %s104_s1 = sshll.u32 %s2418_s13, 4  ;;  %s123_s19 = sshll.u32 %s2419_s27, 4  ;;  %s105_s1 = int_to_ptr.vmem [resolvable:$true] %s104_s1  ;;  %s124_s19 = int_to_ptr.vmem [resolvable:$true] %s123_s19 }
  0xd7   :  { %s2205_s25 = scalar_lea.hbm %s2859_s6, 64 }
  0xd8   :  { %p2206_p4 = scmp.ne.s32.totalorder %s2859_s6, %s2205_s25  ;;  %p2209_p5 = scmp.lt.u32.totalorder %s2205_s25, %s2859_s6 }
  0xda   :  { %p2211_p6 = pnand %p2209_p5, %p2206_p4 }
  0xdc   :  { %2214 = shalt.err (!%p2211_p6)
}
  0xdd   :  { %s2215_s4 = scalar_lea.vmem %s105_s1, 64  ;;  %p2220_p8 = scmp.lt.s32.totalorder %s105_s1, %s105_s1 }
  0xde   :  { %p2216_p7 = scmp.ne.s32.totalorder %s105_s1, %s2215_s4  ;;  %p2221_p9 = scmp.lt.s32.totalorder %s2215_s4, %s2215_s4 }
  0xe0   :  { %p2222_p10 = por %p2221_p9, %p2220_p8 }
  0xe2   :  { %p2223_p11 = pnand %p2222_p10, %p2216_p7 }
  0xe4   :  { %2226 = shalt.err (!%p2223_p11)
}
  0xe5   :  { %107 = dma.hbm_to_vmem [thread:$0]  %s2859_s6, 64, %s105_s1, [#allocation12]  }
  0xe6   :  { %s2227_s28 = scalar_lea.hbm %s2861_s8, 8192 }
  0xe7   :  { %p2228_p12 = scmp.ne.s32.totalorder %s2861_s8, %s2227_s28  ;;  %p2231_p13 = scmp.lt.u32.totalorder %s2227_s28, %s2861_s8 }
  0xe9   :  { %p2233_p0 = pnand %p2231_p13, %p2228_p12 }
  0xeb   :  { %2236 = shalt.err (!%p2233_p0)
}
  0xec   :  { %s2237_s13 = scalar_lea.vmem %s124_s19, 8192  ;;  %p2242_p2 = scmp.lt.s32.totalorder %s124_s19, %s124_s19 }
  0xed   :  { %p2238_p1 = scmp.ne.s32.totalorder %s124_s19, %s2237_s13  ;;  %p2243_p3 = scmp.lt.s32.totalorder %s2237_s13, %s2237_s13 }
  0xef   :  { %p2244_p4 = por %p2243_p3, %p2242_p2 }
  0xf1   :  { %p2245_p5 = pnand %p2244_p4, %p2238_p1 }
  0xf3   :  { %2248 = shalt.err (!%p2245_p5)
}
  0xf4   :  { %s2420_s6 = smov 128   ;;  %s2421_s1 = smov 8  }
  0xf5   :  { %129 = dma.hbm_to_vmem [thread:$0]  %s2861_s8, 8192, %s124_s19, [#allocation15], %s2420_s6, %s2420_s6, %s2421_s1  }
  0xf6   :  { %s2422_s3 = smov [#allocation19]   ;;  %s2423_s2 = smov [#allocation22]  }
  0xf7   :  { %s146_s25 = sshll.u32 %s2422_s3, 4  ;;  %s165_s30 = sshll.u32 %s2423_s2, 4  ;;  %s147_s25 = int_to_ptr.vmem [resolvable:$true] %s146_s25  ;;  %s166_s30 = int_to_ptr.vmem [resolvable:$true] %s165_s30 }
  0xf8   :  { %s2249_s4 = scalar_lea.hbm %s2863_s10, 32 }
  0xf9   :  { %p2250_p6 = scmp.ne.s32.totalorder %s2863_s10, %s2249_s4  ;;  %p2253_p7 = scmp.lt.u32.totalorder %s2249_s4, %s2863_s10 }
  0xfb   :  { %p2255_p8 = pnand %p2253_p7, %p2250_p6 }
  0xfd   :  { %2258 = shalt.err (!%p2255_p8)
}
  0xfe   :  { %s2259_s8 = scalar_lea.vmem %s147_s25, 32  ;;  %p2264_p10 = scmp.lt.s32.totalorder %s147_s25, %s147_s25 }
  0xff   :  { %p2260_p9 = scmp.ne.s32.totalorder %s147_s25, %s2259_s8  ;;  %p2265_p11 = scmp.lt.s32.totalorder %s2259_s8, %s2259_s8 }
 0x101   :  { %p2266_p12 = por %p2265_p11, %p2264_p10 }
 0x103   :  { %p2267_p13 = pnand %p2266_p12, %p2260_p9 }
 0x105   :  { %2270 = shalt.err (!%p2267_p13)
}
 0x106   :  { %149 = dma.hbm_to_vmem [thread:$0]  %s2863_s10, 32, %s147_s25, [#allocation18]  }
 0x107   :  { %s2271_s29 = scalar_lea.hbm %s2865_s12, 2048 }
 0x108   :  { %p2272_p0 = scmp.ne.s32.totalorder %s2865_s12, %s2271_s29  ;;  %p2275_p1 = scmp.lt.u32.totalorder %s2271_s29, %s2865_s12 }
 0x10a   :  { %p2277_p2 = pnand %p2275_p1, %p2272_p0 }
 0x10c   :  { %2280 = shalt.err (!%p2277_p2)
}
 0x10d   :  { %s2281_s27 = scalar_lea.vmem %s166_s30, 2048  ;;  %p2286_p4 = scmp.lt.s32.totalorder %s166_s30, %s166_s30 }
 0x10e   :  { %p2282_p3 = scmp.ne.s32.totalorder %s166_s30, %s2281_s27  ;;  %p2287_p5 = scmp.lt.s32.totalorder %s2281_s27, %s2281_s27 }
 0x110   :  { %p2288_p6 = por %p2287_p5, %p2286_p4 }
 0x112   :  { %p2289_p7 = pnand %p2288_p6, %p2282_p3 }
 0x114   :  { %2292 = shalt.err (!%p2289_p7)
}
 0x115   :  { %171 = dma.hbm_to_vmem [thread:$0]  %s2865_s12, 2048, %s166_s30, [#allocation21], %s2413_s0, %s2413_s0, %s2414_s5  }
 0x116   :  { %s2424_s3 = smov [#allocation25]   ;;  %s2425_s2 = smov [#allocation28]  }
 0x117   :  { %s187_s25 = sshll.u32 %s2424_s3, 4  ;;  %s209_s23 = sshll.u32 %s2425_s2, 4  ;;  %s188_s25 = int_to_ptr.vmem [resolvable:$true] %s187_s25  ;;  %s210_s23 = int_to_ptr.vmem [resolvable:$true] %s209_s23 }
 0x118   :  { %s2293_s20 = scalar_lea.hbm %s2867_s14, 1024 }
 0x119   :  { %p2294_p8 = scmp.ne.s32.totalorder %s2867_s14, %s2293_s20  ;;  %p2297_p9 = scmp.lt.u32.totalorder %s2293_s20, %s2867_s14 }
 0x11b   :  { %p2299_p10 = pnand %p2297_p9, %p2294_p8 }
 0x11d   :  { %2302 = shalt.err (!%p2299_p10)
}
 0x11e   :  { %s2303_s12 = scalar_lea.vmem %s188_s25, 1024  ;;  %p2308_p12 = scmp.lt.s32.totalorder %s188_s25, %s188_s25 }
 0x11f   :  { %p2304_p11 = scmp.ne.s32.totalorder %s188_s25, %s2303_s12  ;;  %p2309_p13 = scmp.lt.s32.totalorder %s2303_s12, %s2303_s12 }
 0x121   :  { %p2310_p0 = por %p2309_p13, %p2308_p12 }
 0x123   :  { %p2311_p1 = pnand %p2310_p0, %p2304_p11 }
 0x125   :  { %2314 = shalt.err (!%p2311_p1)
}
 0x126   :  { %193 = dma.hbm_to_vmem [thread:$0]  %s2867_s14, 1024, %s188_s25, [#allocation24], %s2413_s0, %s2413_s0, %s2414_s5  }
 0x127   :  { %s2315_s24 = scalar_lea.hbm %s2869_s16, 512 }
 0x128   :  { %p2316_p2 = scmp.ne.s32.totalorder %s2869_s16, %s2315_s24  ;;  %p2319_p3 = scmp.lt.u32.totalorder %s2315_s24, %s2869_s16 }
 0x12a   :  { %p2321_p4 = pnand %p2319_p3, %p2316_p2 }
 0x12c   :  { %2324 = shalt.err (!%p2321_p4)
}
 0x12d   :  { %s2325_s1 = scalar_lea.vmem %s210_s23, 512  ;;  %p2330_p6 = scmp.lt.s32.totalorder %s210_s23, %s210_s23 }
 0x12e   :  { %p2326_p5 = scmp.ne.s32.totalorder %s210_s23, %s2325_s1  ;;  %p2331_p7 = scmp.lt.s32.totalorder %s2325_s1, %s2325_s1 }
 0x130   :  { %p2332_p8 = por %p2331_p7, %p2330_p6 }
 0x132   :  { %p2333_p9 = pnand %p2332_p8, %p2326_p5 }
 0x134   :  { %2336 = shalt.err (!%p2333_p9)
}
 0x135   :  { %215 = dma.hbm_to_vmem [thread:$0]  %s2869_s16, 512, %s210_s23, [#allocation27], %s2413_s0, %s2413_s0, %s2414_s5  }
 0x136   :  { %s2426_s10 = smov [#allocation29]   ;;  %s2337_s2 = scalar_lea.hbm %s2870_s17, 16 }
 0x137   :  { %s222_s11 = sshll.u32 %s2426_s10, 4  ;;  %p2338_p10 = scmp.ne.s32.totalorder %s2870_s17, %s2337_s2  ;;  %s223_s11 = int_to_ptr.vmem [resolvable:$true] %s222_s11 }
 0x138   :  { %p2341_p11 = scmp.lt.u32.totalorder %s2337_s2, %s2870_s17 }
 0x13a   :  { %p2343_p12 = pnand %p2341_p11, %p2338_p10 }
 0x13c   :  { %2346 = shalt.err (!%p2343_p12)
}
 0x13d   :  { %s2347_s9 = scalar_lea.vmem %s223_s11, 16  ;;  %s2351_s16 = scalar_lea.vmem %s223_s11, 32 }
 0x13e   :  { %p2348_p13 = scmp.ne.s32.totalorder %s223_s11, %s2347_s9  ;;  %p2352_p0 = scmp.lt.s32.totalorder %s223_s11, %s223_s11 }
 0x13f   :  { %p2353_p1 = scmp.lt.s32.totalorder %s2351_s16, %s2347_s9 }
 0x141   :  { %p2354_p2 = por %p2353_p1, %p2352_p0 }
 0x143   :  { %p2355_p3 = pnand %p2354_p2, %p2348_p13 }
 0x145   :  { %2358 = shalt.err (!%p2355_p3)
}
 0x146   :  { %225 = dma.hbm_to_vmem [thread:$0]  %s2870_s17, 16, %s223_s11, [#allocation30]  }
 0x147   :  { %2381 = dma.done.wait [#allocation3], 128  }
 0x148   :  { %2382 = vsyncadd [#allocation3], 4294967168 }
 0x149   :  { %2383 = dma.done.wait [#allocation6], 1152  }
 0x14a   :  { %2384 = vsyncadd [#allocation6], 4294966144 }
 0x14b   :  { %2385 = dma.done.wait [#allocation9], 1040  }
 0x14c   :  { %2386 = vsyncadd [#allocation9], 4294966256 }
 0x14d   :  { %2387 = dma.done.wait [#allocation12], 128  }
 0x14e   :  { %2388 = vsyncadd [#allocation12], 4294967168 }
 0x14f   :  { %2389 = dma.done.wait [#allocation15], 8256  }
 0x150   :  { %2390 = vsyncadd [#allocation15], 4294959040 }
 0x151   :  { %2391 = dma.done.wait [#allocation18], 64  }
 0x152   :  { %2392 = vsyncadd [#allocation18], 4294967232 }
 0x153   :  { %2393 = dma.done.wait [#allocation21], 2080  }
 0x154   :  { %2394 = vsyncadd [#allocation21], 4294965216 }
 0x155   :  { %2395 = dma.done.wait [#allocation24], 1040  }
 0x156   :  { %2396 = vsyncadd [#allocation24], 4294966256 }
 0x157   :  { %2397 = dma.done.wait [#allocation27], 528  }
 0x158   :  { %2398 = vsyncadd [#allocation27], 4294966768 }
 0x159   :  { %2399 = dma.done.wait [#allocation30], 16  }
 0x15a   :  { %2400 = vsyncadd [#allocation30], 4294967280  ;;  %v2427_v0 = vmov 0.0   ;;  %vm2428_vm0 = vmmov 0   ;;  %v1815_v1 = vld [vmem:[#allocation7] sm:$0xff]   ;;  %v1816_v2 = vld [vmem:[#allocation7 + $0x8] sm:$0xff]   ;;  %v407_v46 = vlaneseq }
 0x15b   :  { %1729 = vmatprep.subr.bf16.mxu0 %v2427_v0  ;;  %1745 = vmatprep.mubr.msk.bf16.mxu0 %vm2428_vm0, %v2427_v0  ;;  %v1817_v3 = vld [vmem:[#allocation7 + $0x10] sm:$0xff]   ;;  %v1818_v4 = vld [vmem:[#allocation7 + $0x18] sm:$0xff]   ;;  %v1819_v5 = vld [vmem:[#allocation7 + $0x20] sm:$0xff]   ;;  %v2429_v16 = vmov 0   ;;  %vm467_vm1 = vcmask 261120   ;;  %vm1500_vm2 = vcmask 523264  }
 0x15c   :  { %1730 = vmatpush3.bf16.msra.mxu0 %v1815_v1  ;;  %v1820_v6 = vld [vmem:[#allocation7 + $0x28] sm:$0xff]   ;;  %v1821_v7 = vld [vmem:[#allocation7 + $0x30] sm:$0xff]   ;;  %v1822_v8 = vld [vmem:[#allocation7 + $0x38] sm:$0xff]   ;;  %v408_v47 = vshrl.u32 %v407_v46, 7  ;;  %s2430_s17 = smov [#allocation31]  }
 0x15d   :  { %1731 = vmatprep.subr.bf16.mxu0 %v2427_v0  ;;  %v281_v9 = vld [vmem:[#allocation5] sm:$0xff]  ;;  %v1823_v11 = vld [vmem:[#allocation10] ss:$16 sps:$4 sm:$0xff]   ;;  %v1569_v17 = vld [vmem:[#allocation8] ss:$0 sm:$0xff]  ;;  %s1551_s23 = sshll.u32 %s2430_s17, 4  ;;  %s1552_s23 = int_to_ptr.vmem [resolvable:$true] %s1551_s23 }
 0x15e   :  { %v1825_v10 = vld [vmem:[#allocation10 + $0x4] ss:$16 sps:$4 sm:$0xff]   ;;  %v282_v12 = vpack.c.bf16 %v281_v9, %v281_v9  ;;  %v1826_v14 = vld [vmem:[#allocation10 + $0x20] ss:$16 sps:$4 sm:$0xff]   ;;  %v1831_v15 = vld [vmem:[#allocation10 + $0xc] ss:$16 sps:$4 sm:$0xff]   ;;  %p2364_p5 = scmp.lt.s32.totalorder %s1552_s23, %s1552_s23 }
 0x15f   :  { %v1828_v13 = vld [vmem:[#allocation10 + $0x24] ss:$16 sps:$4 sm:$0xff]   ;;  %v1829_v25 = vld [vmem:[#allocation10 + $0x8] ss:$16 sps:$4 sm:$0xff]   ;;  %v1834_v27 = vld [vmem:[#allocation10 + $0x2c] ss:$16 sps:$4 sm:$0xff]  }
 0x160   :  { %1732 = vmatpush3.bf16.msra.mxu0 %v1816_v2  ;;  %v394_v19 = vld [vmem:[#allocation2] sm:$0xff]  ;;  %v1832_v28 = vld [vmem:[#allocation10 + $0x28] ss:$16 sps:$4 sm:$0xff]   ;;  %v1840_v32 = vld [vmem:[#allocation16 + $0x10] ss:$8 sps:$4 sm:$0xff]   ;;  %v2771_v48 = vsub.s32 0, %v408_v47 }
 0x161   :  { %1733 = vmatprep.subr.bf16.mxu0 %v2427_v0  ;;  %v1835_v29 = vld [vmem:[#allocation16 + $0x4] ss:$8 sps:$4 sm:$0xff]   ;;  %v1837_v30 = vld [vmem:[#allocation16] ss:$8 sps:$4 sm:$0xff]   ;;  %v1838_v31 = vld [vmem:[#allocation16 + $0x14] ss:$8 sps:$4 sm:$0xff]  }
 0x162   :  { %1038 = vmatprep.subr.bf16.mxu1 %v1835_v29  ;;  %v1841_v33 = vld [vmem:[#allocation16 + $0x24] ss:$8 sps:$4 sm:$0xff]   ;;  %v1843_v34 = vld [vmem:[#allocation16 + $0x20] ss:$8 sps:$4 sm:$0xff]   ;;  %v1844_v35 = vld [vmem:[#allocation16 + $0x34] ss:$8 sps:$4 sm:$0xff]  }
 0x163   :  { %1039 = vmatpush1.bf16.msra.mxu1 %v1837_v30  ;;  %v1846_v36 = vld [vmem:[#allocation16 + $0x30] ss:$8 sps:$4 sm:$0xff]   ;;  %v1847_v37 = vld [vmem:[#allocation16 + $0x44] ss:$8 sps:$4 sm:$0xff]   ;;  %v1849_v38 = vld [vmem:[#allocation16 + $0x40] ss:$8 sps:$4 sm:$0xff]  }
 0x164   :  { %1734 = vmatpush3.bf16.msra.mxu0 %v1817_v3  ;;  %1040 = vmatprep.subr.bf16.mxu1 %v1838_v31  ;;  %v1850_v39 = vld [vmem:[#allocation16 + $0x54] ss:$8 sps:$4 sm:$0xff]   ;;  %v1852_v40 = vld [vmem:[#allocation16 + $0x50] ss:$8 sps:$4 sm:$0xff]   ;;  %v1853_v41 = vld [vmem:[#allocation16 + $0x64] ss:$8 sps:$4 sm:$0xff]  }
 0x165   :  { %1735 = vmatprep.subr.bf16.mxu0 %v2427_v0  ;;  %v1855_v42 = vld [vmem:[#allocation16 + $0x60] ss:$8 sps:$4 sm:$0xff]   ;;  %v1856_v43 = vld [vmem:[#allocation16 + $0x74] ss:$8 sps:$4 sm:$0xff]   ;;  %v1858_v44 = vld [vmem:[#allocation16 + $0x70] ss:$8 sps:$4 sm:$0xff]  }
 0x166   :  { %v1859_v45 = vld [vmem:[#allocation16 + $0x84] ss:$8 sps:$4 sm:$0xff]   ;;  %v405_v49 = vld [vmem:[#allocation11] sm:$0xf]  ;;  %v2773_v50 = vsub.s32 1, %v408_v47  ;;  %v2777_v56 = vsub.s32 2, %v408_v47 }
 0x167   :  { %1041 = vmatpush1.bf16.msra.mxu1 %v1840_v32  ;;  %v410_v51 = vrot.slane %v405_v49, %v2771_v48  ;;  %v2779_v59 = vsub.s32 3, %v408_v47  ;;  %v1874_v29 = vld [vmem:[#allocation16 + $0xd4] ss:$8 sps:$4 sm:$0xff]   ;;  %v1876_v30 = vld [vmem:[#allocation16 + $0xd0] ss:$8 sps:$4 sm:$0xff]   ;;  %s2359_s22 = scalar_lea.vmem %s1552_s23, 128 }
 0x168   :  { %1736 = vmatpush3.bf16.msra.mxu0 %v1818_v4  ;;  %1042 = vmatprep.subr.bf16.mxu1 %v1841_v33  ;;  %v414_v52 = vrot.slane %v405_v49, %v2773_v50  ;;  %v418_v63 = vrot.slane %v405_v49, %v2777_v56  ;;  %v1877_v31 = vld [vmem:[#allocation16 + $0xe4] ss:$8 sps:$4 sm:$0xff]   ;;  %v1879_v32 = vld [vmem:[#allocation16 + $0xe0] ss:$8 sps:$4 sm:$0xff]   ;;  %v1880_v33 = vld [vmem:[#allocation16 + $0xf4] ss:$8 sps:$4 sm:$0xff]   ;;  %p2360_p4 = scmp.ne.s32.totalorder %s1552_s23, %s2359_s22  ;;  %p2365_p6 = scmp.lt.s32.totalorder %s2359_s22, %s2359_s22 }
 0x169   :  { %1737 = vmatprep.subr.bf16.mxu0 %v2427_v0  ;;  %v422_v1 = vrot.slane %v405_v49, %v2779_v59 }
 0x16a   :  { %p2366_p7 = por %p2365_p6, %p2364_p5 }
 0x16b   :  { %1043 = vmatpush1.bf16.msra.mxu1 %v1843_v34  ;;  %v1882_v34 = vld [vmem:[#allocation16 + $0xf0] ss:$8 sps:$4 sm:$0xff]  }
 0x16c   :  { %1738 = vmatpush3.bf16.msra.mxu0 %v1819_v5  ;;  %1044 = vmatprep.subr.bf16.mxu1 %v1844_v35  ;;  %v1885_v35 = vld [vmem:[#allocation16 + $0x104] ss:$8 sps:$4 sm:$0xff]   ;;  %p2367_p8 = pnand %p2366_p7, %p2360_p4 }
 0x16d   :  { %1739 = vmatprep.subr.bf16.mxu0 %v2427_v0 }
 0x16f   :  { %1045 = vmatpush1.bf16.msra.mxu1 %v1846_v36 }
 0x170   :  { %1740 = vmatpush3.bf16.msra.mxu0 %v1820_v6  ;;  %1046 = vmatprep.subr.bf16.mxu1 %v1847_v37 }
 0x171   :  { %1741 = vmatprep.subr.bf16.mxu0 %v2427_v0 }
 0x173   :  { %1047 = vmatpush1.bf16.msra.mxu1 %v1849_v38 }
 0x174   :  { %1742 = vmatpush3.bf16.msra.mxu0 %v1821_v7  ;;  %1048 = vmatprep.subr.bf16.mxu1 %v1850_v39 }
 0x175   :  { %1743 = vmatprep.subr.bf16.mxu0 %v2427_v0 }
 0x177   :  { %1049 = vmatpush1.bf16.msra.mxu1 %v1852_v40 }
 0x178   :  { %1744 = vmatpush3.bf16.msra.mxu0 %v1822_v8  ;;  %1050 = vmatprep.subr.bf16.mxu1 %v1853_v41 }
 0x179   :  { %471 = vmatprep.subr.bf16.mxu0 %v1825_v10 }
 0x17b   :  { %1746 = vmatmul.mubr.bf16.vlgmr.msra.gmra.mrb[0].mxu0 %v282_v12  ;;  %1051 = vmatpush1.bf16.msra.mxu1 %v1855_v42 }
 0x17c   :  { %472 = vmatpush1.bf16.msra.mxu0 %v1823_v11  ;;  %503 = vmatprep.mubr.bf16.mxu0 %v2429_v16 }
 0x17d   :  { %473 = vmatprep.subr.bf16.mxu0 %v1828_v13  ;;  %1052 = vmatprep.subr.bf16.mxu1 %v1856_v43 }
 0x17f   :  { %1053 = vmatpush1.bf16.msra.mxu1 %v1858_v44  ;;  %v557_v44 = vld [vmem:[#allocation13] sm:$0xf] }
 0x180   :  { %474 = vmatpush1.bf16.msra.mxu0 %v1826_v14  ;;  %1054 = vmatprep.subr.bf16.mxu1 %v1859_v45  ;;  %v558_v45 = vld [vmem:[#allocation14] sm:$0xf]  ;;  %v596_v46 = vrot.slane %v557_v44, %v2773_v50  ;;  %v592_v47 = vrot.slane %v557_v44, %v2771_v48  ;;  %v604_v49 = vrot.slane %v557_v44, %v2779_v59 }
 0x181   :  { %512 = vmatprep.subr.bf16.mxu0 %v1831_v15 }
 0x24e   :  { %v388_v18 = vpop.f32.mrb[0].mxu0 }
 0x24f   :  { %v389_v20 = vadd.f32 %v1569_v17, %v388_v18  ;;  %v1747_v21 = vpop.f32.mrb[1].mxu0 }
 0x250   :  { %v391_v22 = vpop.f32.mrb[2].mxu0  ;;  %v1862_v21 = vld [vmem:[#allocation16 + $0x94] ss:$8 sps:$4 sm:$0xff]  }
 0x251   :  { %v395_v23 = vmul.f32 %v394_v19, %v389_v20  ;;  %v1748_v24 = vpop.f32.mrb[3].mxu0  ;;  %v1861_v20 = vld [vmem:[#allocation16 + $0x80] ss:$8 sps:$4 sm:$0xff]   ;;  %v1864_v22 = vld [vmem:[#allocation16 + $0x90] ss:$8 sps:$4 sm:$0xff]  }
 0x252   :  { %1055 = vmatpush1.bf16.msra.mxu1 %v1861_v20  ;;  %v1867_v24 = vld [vmem:[#allocation16 + $0xa0] ss:$8 sps:$4 sm:$0xff]   ;;  %v1897_v20 = vld [vmem:[#allocation16 + $0x144] ss:$8 sps:$4 sm:$0xff]  }
 0x253   :  { %v396_v26 = vpack.c.bf16 %v395_v23, %v395_v23  ;;  %1056 = vmatprep.subr.bf16.mxu1 %v1862_v21  ;;  %v1865_v23 = vld [vmem:[#allocation16 + $0xa4] ss:$8 sps:$4 sm:$0xff]   ;;  %v1895_v21 = vld [vmem:[#allocation16 + $0x140] ss:$8 sps:$4 sm:$0xff]  }
 0x255   :  { %1586 = vmatmul.mubr.msk.bf16.vlgmr.msra.gmra.mrb[4].mxu0 %vm467_vm1, %v396_v26 }
 0x256   :  { %513 = vmatpush1.bf16.msra.mxu0 %v1829_v25  ;;  %544 = vmatprep.mubr.bf16.mxu0 %v2429_v16  ;;  %v1868_v25 = vld [vmem:[#allocation16 + $0xb4] ss:$8 sps:$4 sm:$0xff]  }
 0x257   :  { %514 = vmatprep.subr.bf16.mxu0 %v1834_v27  ;;  %1057 = vmatpush1.bf16.msra.mxu1 %v1864_v22  ;;  %v1871_v27 = vld [vmem:[#allocation16 + $0xc4] ss:$8 sps:$4 sm:$0xff]   ;;  %v1900_v22 = vld [vmem:[#allocation16 + $0x154] ss:$8 sps:$4 sm:$0xff]  }
 0x258   :  { %1058 = vmatprep.subr.bf16.mxu1 %v1865_v23  ;;  %v1898_v23 = vld [vmem:[#allocation16 + $0x150] ss:$8 sps:$4 sm:$0xff]  }
 0x25a   :  { %515 = vmatpush1.bf16.msra.mxu0 %v1832_v28  ;;  %v1873_v28 = vld [vmem:[#allocation16 + $0xc0] ss:$8 sps:$4 sm:$0xff]  }
 0x25b   :  { %1059 = vmatpush1.bf16.msra.mxu1 %v1867_v24  ;;  %v1903_v24 = vld [vmem:[#allocation16 + $0x164] ss:$8 sps:$4 sm:$0xff]  }
 0x25c   :  { %1060 = vmatprep.subr.bf16.mxu1 %v1868_v25  ;;  %v1901_v25 = vld [vmem:[#allocation16 + $0x160] ss:$8 sps:$4 sm:$0xff]  }
 0x25d   :  { %1587 = vmatmul.mubr.msk.bf16.vlgmr.msra.gmra.mrb[8].mxu0 %vm467_vm1, %v396_v26  ;;  %v1870_v26 = vld [vmem:[#allocation16 + $0xb0] ss:$8 sps:$4 sm:$0xff]  }
 0x25f   :  { %1061 = vmatpush1.bf16.msra.mxu1 %v1870_v26  ;;  %v1906_v26 = vld [vmem:[#allocation16 + $0x174] ss:$8 sps:$4 sm:$0xff]  }
 0x260   :  { %1062 = vmatprep.subr.bf16.mxu1 %v1871_v27  ;;  %v1904_v27 = vld [vmem:[#allocation16 + $0x170] ss:$8 sps:$4 sm:$0xff]  }
 0x263   :  { %1063 = vmatpush1.bf16.msra.mxu1 %v1873_v28  ;;  %v1909_v28 = vld [vmem:[#allocation16 + $0x184] ss:$8 sps:$4 sm:$0xff]  }
 0x264   :  { %1064 = vmatprep.subr.bf16.mxu1 %v1874_v29  ;;  %v1907_v29 = vld [vmem:[#allocation16 + $0x180] ss:$8 sps:$4 sm:$0xff]  }
 0x267   :  { %1065 = vmatpush1.bf16.msra.mxu1 %v1876_v30  ;;  %v1912_v30 = vld [vmem:[#allocation16 + $0x194] ss:$8 sps:$4 sm:$0xff]  }
 0x268   :  { %1066 = vmatprep.subr.bf16.mxu1 %v1877_v31  ;;  %v1910_v31 = vld [vmem:[#allocation16 + $0x190] ss:$8 sps:$4 sm:$0xff]  }
 0x26b   :  { %1067 = vmatpush1.bf16.msra.mxu1 %v1879_v32  ;;  %v1915_v32 = vld [vmem:[#allocation16 + $0x1a4] ss:$8 sps:$4 sm:$0xff]  }
 0x26c   :  { %1068 = vmatprep.subr.bf16.mxu1 %v1880_v33  ;;  %v1913_v33 = vld [vmem:[#allocation16 + $0x1a0] ss:$8 sps:$4 sm:$0xff]  }
 0x26f   :  { %1069 = vmatpush1.bf16.msra.mxu1 %v1882_v34  ;;  %v1918_v34 = vld [vmem:[#allocation16 + $0x1b4] ss:$8 sps:$4 sm:$0xff]  }
 0x270   :  { %1079 = vmatprep.subr.bf16.mxu1 %v1885_v35  ;;  %v1916_v35 = vld [vmem:[#allocation16 + $0x1b0] ss:$8 sps:$4 sm:$0xff]  }
 0x328   :  { %v505_v53 = vpop.f32.mrb[4].mxu0 }
 0x329   :  { %v506_v54 = vadd.f32 %v505_v53, %v410_v51  ;;  %v507_v55 = vpop.f32.mrb[5].mxu0  ;;  %v600_v51 = vrot.slane %v557_v44, %v2777_v56 }
 0x32a   :  { %v508_v57 = vadd.f32 %v507_v55, %v414_v52  ;;  %v509_v58 = vpop.f32.mrb[6].mxu0 }
 0x32b   :  { %v510_v60 = vpop.f32.mrb[7].mxu0  ;;  %v2781_v61 = vmax.f32 %v506_v54, 0.0  ;;  %v621_v58 = vrot.slane %v558_v45, %v2773_v50 }
 0x32c   :  { %v2783_v62 = vmax.f32 %v508_v57, 0.0  ;;  %v617_v60 = vrot.slane %v558_v45, %v2771_v48 }
 0x32d   :  { %v564_v3 = vmul.f32 %v2781_v61, %v2781_v61 }
 0x32e   :  { %v565_v4 = vmul.f32 %v2783_v62, %v2783_v62  ;;  %v559_v11 = vadd.f32 %v2783_v62, %v2781_v61 }
 0x330   :  { %v546_v2 = vpop.f32.mrb[8].mxu0  ;;  %v568_v15 = vadd.f32 %v565_v4, %v564_v3 }
 0x331   :  { %v547_v5 = vadd.f32 %v546_v2, %v418_v63  ;;  %v548_v6 = vpop.f32.mrb[9].mxu0  ;;  %v629_v63 = vrot.slane %v558_v45, %v2779_v59 }
 0x332   :  { %v549_v7 = vadd.f32 %v548_v6, %v422_v1  ;;  %v550_v8 = vpop.f32.mrb[10].mxu0  ;;  %v625_v1 = vrot.slane %v558_v45, %v2777_v56  ;;  %v1886_v56 = vld [vmem:[#allocation16 + $0x110] ss:$8 sps:$4 sm:$0xff]   ;;  %v706_v45 = vld [vmem:[#allocation17] sm:$0x3] }
 0x333   :  { %v2791_v9 = vmax.f32 %v547_v5, 0.0  ;;  %v551_v10 = vpop.f32.mrb[11].mxu0 }
 0x334   :  { %v2795_v12 = vmax.f32 %v549_v7, 0.0 }
 0x335   :  { %v560_v13 = vadd.f32 %v559_v11, %v2791_v9  ;;  %v566_v14 = vmul.f32 %v2791_v9, %v2791_v9 }
 0x336   :  { %v567_v17 = vmul.f32 %v2795_v12, %v2795_v12 }
 0x337   :  { %v561_v16 = vadd.f32 %v560_v13, %v2795_v12  ;;  %v569_v18 = vadd.f32 %v568_v15, %v566_v14  ;;  %v1883_v13 = vld [vmem:[#allocation16 + $0x100] ss:$8 sps:$4 sm:$0xff]   ;;  %v1888_v15 = vld [vmem:[#allocation16 + $0x114] ss:$8 sps:$4 sm:$0xff]  }
 0x339   :  { %562 = vadd.xlane.f32.xlu0 %v561_v16  ;;  %v570_v19 = vadd.f32 %v569_v18, %v567_v17  ;;  %v1891_v16 = vld [vmem:[#allocation16 + $0x124] ss:$8 sps:$4 sm:$0xff]   ;;  %v1889_v17 = vld [vmem:[#allocation16 + $0x120] ss:$8 sps:$4 sm:$0xff]   ;;  %v1894_v18 = vld [vmem:[#allocation16 + $0x134] ss:$8 sps:$4 sm:$0xff]  }
 0x33d   :  { %571 = vadd.xlane.f32.xlu0 %v570_v19  ;;  %v1892_v19 = vld [vmem:[#allocation16 + $0x130] ss:$8 sps:$4 sm:$0xff]  }
 0x3c6   :  { %v563_v36 = vpop.xlane.xlu0 %562 }
 0x3c7   :  { %v573_v37 = vmul.f32 0.001953125, %v563_v36  ;;  %v1921_v36 = vld [vmem:[#allocation16 + $0x1c4] ss:$8 sps:$4 sm:$0xff]  }
 0x3c9   :  { %v575_v39 = vmul.f32 %v573_v37, %v573_v37  ;;  %v580_v52 = vsub.f32 %v2791_v9, %v573_v37  ;;  %v579_v53 = vsub.f32 %v2783_v62, %v573_v37  ;;  %v578_v54 = vsub.f32 %v2781_v61, %v573_v37 }
 0x3ca   :  { %v572_v38 = vpop.xlane.xlu0 %571  ;;  %v581_v55 = vsub.f32 %v2795_v12, %v573_v37  ;;  %v1919_v37 = vld [vmem:[#allocation16 + $0x1c0] ss:$8 sps:$4 sm:$0xff]  }
 0x3cb   :  { %v574_v40 = vmul.f32 0.001953125, %v572_v38  ;;  %v1924_v38 = vld [vmem:[#allocation16 + $0x1d4] ss:$8 sps:$4 sm:$0xff]  }
 0x3cd   :  { %v576_v41 = vsub.f32 %v574_v40, %v575_v39  ;;  %v1922_v39 = vld [vmem:[#allocation16 + $0x1d0] ss:$8 sps:$4 sm:$0xff]   ;;  %v1927_v40 = vld [vmem:[#allocation16 + $0x1e4] ss:$8 sps:$4 sm:$0xff]  }
 0x3cf   :  { %v577_v42 = vmax.f32 %v576_v41, 0.0  ;;  %v1925_v41 = vld [vmem:[#allocation16 + $0x1e0] ss:$8 sps:$4 sm:$0xff]  }
 0x3d1   :  { %v582_v43 = vadd.f32 1e-05, %v577_v42  ;;  %v1930_v42 = vld [vmem:[#allocation16 + $0x1f4] ss:$8 sps:$4 sm:$0xff]  }
 0x3d3   :  { %1959 = vrsqrt.f32 %v582_v43  ;;  %v1928_v43 = vld [vmem:[#allocation16 + $0x1f0] ss:$8 sps:$4 sm:$0xff]  }
 0x3dd   :  { %v1960_v57 = vpop.eup %1959 }
 0x3de   :  { %v585_v2 = vmul.f32 %v1960_v57, %v579_v53  ;;  %v584_v3 = vmul.f32 %v1960_v57, %v578_v54  ;;  %v587_v4 = vmul.f32 %v1960_v57, %v581_v55  ;;  %v586_v5 = vmul.f32 %v1960_v57, %v580_v52 }
 0x3e0   :  { %v610_v6 = vmul.f32 %v596_v46, %v585_v2  ;;  %v609_v7 = vmul.f32 %v592_v47, %v584_v3  ;;  %v612_v62 = vmul.f32 %v604_v49, %v587_v4  ;;  %v611_v8 = vmul.f32 %v600_v51, %v586_v5  ;;  %v1931_v3 = vld [vmem:[#allocation22 + $0x40] sm:$0xff]   ;;  %v1933_v5 = vld [vmem:[#allocation22 + $0x48] sm:$0xff]  }
 0x3e1   :  { %v711_v46 = vrot.slane %v706_v45, %v2771_v48  ;;  %v715_v47 = vrot.slane %v706_v45, %v2773_v50  ;;  %v1932_v4 = vld [vmem:[#allocation22] sm:$0xff]   ;;  %1693 = vmatprep.subr.bf16.mxu0 %v1931_v3 }
 0x3e2   :  { %v635_v61 = vadd.f32 %v621_v58, %v610_v6  ;;  %v634_v9 = vadd.f32 %v617_v60, %v609_v7  ;;  %v637_v10 = vadd.f32 %v629_v63, %v612_v62  ;;  %v2815_v11 = vadd.f32 %v625_v1, %v611_v8  ;;  %1694 = vmatpush3.bf16.msra.mxu0 %v1932_v4  ;;  %v1934_v6 = vld [vmem:[#allocation22 + $0x8] sm:$0xff]   ;;  %v1935_v7 = vld [vmem:[#allocation22 + $0x50] sm:$0xff]   ;;  %v1937_v8 = vld [vmem:[#allocation22 + $0x58] sm:$0xff]  }
 0x3e3   :  { %1695 = vmatprep.subr.bf16.mxu0 %v1933_v5  ;;  %v1936_v62 = vld [vmem:[#allocation22 + $0x10] sm:$0xff]   ;;  %v1954_v45 = vld [vmem:[#allocation25 + $0x38] sm:$0xff]  }
 0x3e4   :  { %v639_v12 = vpack.c.bf16 %v635_v61, %v635_v61  ;;  %v638_v14 = vpack.c.bf16 %v634_v9, %v634_v9  ;;  %v641_v59 = vpack.c.bf16 %v637_v10, %v637_v10  ;;  %v640_v44 = vpack.c.bf16 %v2815_v11, %v2815_v11  ;;  %v1938_v61 = vld [vmem:[#allocation22 + $0x18] sm:$0xff]   ;;  %v1939_v9 = vld [vmem:[#allocation22 + $0x60] sm:$0xff]   ;;  %v1941_v11 = vld [vmem:[#allocation22 + $0x68] sm:$0xff]  }
 0x3e5   :  { %v1940_v10 = vld [vmem:[#allocation22 + $0x20] sm:$0xff]  }
 0x3e6   :  { %1070 = vmatprep.mubr.bf16.mxu1 %v639_v12  ;;  %1696 = vmatpush3.bf16.msra.mxu0 %v1934_v6  ;;  %v1942_v12 = vld [vmem:[#allocation22 + $0x28] sm:$0xff]  }
 0x3e7   :  { %1071 = vmatmul.mubr.bf16.vlgmr.msra.gmra.mrb[0].mxu1 %v638_v14  ;;  %1697 = vmatprep.subr.bf16.mxu0 %v1935_v7  ;;  %v1944_v14 = vld [vmem:[#allocation22 + $0x30] sm:$0xff]  }
 0x3e8   :  { %1080 = vmatpush1.bf16.msra.mxu1 %v1883_v13  ;;  %1111 = vmatprep.mubr.bf16.mxu1 %v641_v59  ;;  %v1943_v13 = vld [vmem:[#allocation22 + $0x70] sm:$0xff]   ;;  %v1946_v59 = vld [vmem:[#allocation22 + $0x38] sm:$0xff]  }
 0x3e9   :  { %1081 = vmatprep.subr.bf16.mxu1 %v1888_v15  ;;  %v1945_v15 = vld [vmem:[#allocation22 + $0x78] sm:$0xff]  }
 0x3ea   :  { %1698 = vmatpush3.bf16.msra.mxu0 %v1936_v62 }
 0x3eb   :  { %1699 = vmatprep.subr.bf16.mxu0 %v1937_v8 }
 0x3ec   :  { %1082 = vmatpush1.bf16.msra.mxu1 %v1886_v56 }
 0x3ed   :  { %1083 = vmatprep.subr.bf16.mxu1 %v1891_v16 }
 0x3ee   :  { %1700 = vmatpush3.bf16.msra.mxu0 %v1938_v61  ;;  %v1678_v61 = vld [vmem:[#allocation29] ss:$0 sm:$0xff] }
 0x3ef   :  { %1701 = vmatprep.subr.bf16.mxu0 %v1939_v9 }
 0x3f0   :  { %1084 = vmatpush1.bf16.msra.mxu1 %v1889_v17 }
 0x3f1   :  { %1085 = vmatprep.subr.bf16.mxu1 %v1894_v18 }
 0x3f2   :  { %1702 = vmatpush3.bf16.msra.mxu0 %v1940_v10 }
 0x3f3   :  { %1703 = vmatprep.subr.bf16.mxu0 %v1941_v11 }
 0x3f4   :  { %1086 = vmatpush1.bf16.msra.mxu1 %v1892_v19 }
 0x3f5   :  { %1087 = vmatprep.subr.bf16.mxu1 %v1897_v20 }
 0x3f6   :  { %1704 = vmatpush3.bf16.msra.mxu0 %v1942_v12 }
 0x3f7   :  { %1705 = vmatprep.subr.bf16.mxu0 %v1943_v13 }
 0x3f8   :  { %1088 = vmatpush1.bf16.msra.mxu1 %v1895_v21 }
 0x3f9   :  { %1089 = vmatprep.subr.bf16.mxu1 %v1900_v22 }
 0x3fa   :  { %1706 = vmatpush3.bf16.msra.mxu0 %v1944_v14 }
 0x3fb   :  { %1707 = vmatprep.subr.bf16.mxu0 %v1945_v15 }
 0x3fc   :  { %1090 = vmatpush1.bf16.msra.mxu1 %v1898_v23  ;;  %v1122_v23 = vld [vmem:[#allocation19] sm:$0x3] }
 0x3fd   :  { %1091 = vmatprep.subr.bf16.mxu1 %v1903_v24  ;;  %v1123_v24 = vld [vmem:[#allocation20] sm:$0x3] }
 0x3fe   :  { %1708 = vmatpush3.bf16.msra.mxu0 %v1946_v59 }
 0x3ff   :  { %1749 = vmatprep.subr.bf16.mxu0 %v2427_v0 }
 0x400   :  { %1092 = vmatpush1.bf16.msra.mxu1 %v1901_v25 }
 0x401   :  { %1093 = vmatprep.subr.bf16.mxu1 %v1906_v26 }
 0x404   :  { %1094 = vmatpush1.bf16.msra.mxu1 %v1904_v27  ;;  %v1147_v27 = vrot.slane %v1122_v23, %v2771_v48 }
 0x405   :  { %1095 = vmatprep.subr.bf16.mxu1 %v1909_v28  ;;  %v1151_v28 = vrot.slane %v1122_v23, %v2773_v50 }
 0x408   :  { %1096 = vmatpush1.bf16.msra.mxu1 %v1907_v29 }
 0x409   :  { %1097 = vmatprep.subr.bf16.mxu1 %v1912_v30 }
 0x40c   :  { %1098 = vmatpush1.bf16.msra.mxu1 %v1910_v31  ;;  %v1160_v31 = vrot.slane %v1123_v24, %v2771_v48  ;;  %v1949_v48 = vld [vmem:[#allocation25 + $0x10] sm:$0xff]  }
 0x40d   :  { %1099 = vmatprep.subr.bf16.mxu1 %v1915_v32  ;;  %v1164_v32 = vrot.slane %v1123_v24, %v2773_v50  ;;  %v1950_v50 = vld [vmem:[#allocation25 + $0x18] sm:$0xff]  }
 0x410   :  { %1100 = vmatpush1.bf16.msra.mxu1 %v1913_v33 }
 0x411   :  { %1101 = vmatprep.subr.bf16.mxu1 %v1918_v34 }
 0x414   :  { %1102 = vmatpush1.bf16.msra.mxu1 %v1916_v35 }
 0x415   :  { %1103 = vmatprep.subr.bf16.mxu1 %v1921_v36 }
 0x418   :  { %1104 = vmatpush1.bf16.msra.mxu1 %v1919_v37 }
 0x419   :  { %1105 = vmatprep.subr.bf16.mxu1 %v1924_v38 }
 0x41c   :  { %1106 = vmatpush1.bf16.msra.mxu1 %v1922_v39 }
 0x41d   :  { %1107 = vmatprep.subr.bf16.mxu1 %v1927_v40  ;;  %v1947_v40 = vld [vmem:[#allocation25] sm:$0xff]  }
 0x420   :  { %1108 = vmatpush1.bf16.msra.mxu1 %v1925_v41  ;;  %v1948_v41 = vld [vmem:[#allocation25 + $0x8] sm:$0xff]  }
 0x421   :  { %1109 = vmatprep.subr.bf16.mxu1 %v1930_v42  ;;  %v1951_v42 = vld [vmem:[#allocation25 + $0x20] sm:$0xff]  }
 0x424   :  { %1110 = vmatpush1.bf16.msra.mxu1 %v1928_v43  ;;  %v1952_v43 = vld [vmem:[#allocation25 + $0x28] sm:$0xff]  }
 0x427   :  { %1112 = vmatmul.mubr.bf16.vlgmr.msra.gmra.mrb[0].mxu1 %v640_v44  ;;  %v1953_v44 = vld [vmem:[#allocation25 + $0x30] sm:$0xff]  }
 0x4fa   :  { %v1113_v49 = vpop.f32.mrb[0].mxu1 }
 0x4fb   :  { %v1781_v51 = vadd.f32 %v1113_v49, %v711_v46  ;;  %v1115_v52 = vpop.f32.mrb[1].mxu1 }
 0x4fc   :  { %v1782_v53 = vadd.f32 %v1115_v52, %v715_v47  ;;  %v1117_v54 = vpop.f32.mrb[2].mxu1  ;;  %v1652_v47 = vld [vmem:[#allocation23] ss:$0 sm:$0xff] }
 0x4fd   :  { %v1120_v55 = vmax.f32 %v1781_v51, 0.0  ;;  %v1118_v57 = vpop.f32.mrb[3].mxu1 }
 0x4fe   :  { %v1121_v58 = vmax.f32 %v1782_v53, 0.0  ;;  %v1955_v57 = vld [vmem:[#allocation28] sm:$0xff]  }
 0x4ff   :  { %v1127_v63 = vmul.f32 %v1120_v55, %v1120_v55 }
 0x500   :  { %v1124_v60 = vadd.f32 %v1121_v58, %v1120_v55  ;;  %v1128_v1 = vmul.f32 %v1121_v58, %v1121_v58 }
 0x502   :  { %1125 = vadd.xlane.f32.xlu1 %v1124_v60  ;;  %v1129_v2 = vadd.f32 %v1128_v1, %v1127_v63  ;;  %v1956_v60 = vld [vmem:[#allocation28 + $0x8] sm:$0xff]   ;;  %v1957_v63 = vld [vmem:[#allocation28 + $0x10] sm:$0xff]   ;;  %v1958_v1 = vld [vmem:[#allocation28 + $0x18] sm:$0xff]  }
 0x506   :  { %1130 = vadd.xlane.f32.xlu1 %v1129_v2  ;;  %v1669_v2 = vld [vmem:[#allocation26] ss:$0 sm:$0xff] }
 0x58f   :  { %v1126_v56 = vpop.xlane.xlu1 %1125 }
 0x590   :  { %v1132_v16 = vmul.f32 0.00390625, %v1126_v56 }
 0x592   :  { %v1134_v18 = vmul.f32 %v1132_v16, %v1132_v16  ;;  %v1137_v25 = vsub.f32 %v1120_v55, %v1132_v16  ;;  %v1138_v26 = vsub.f32 %v1121_v58, %v1132_v16 }
 0x593   :  { %v1131_v17 = vpop.xlane.xlu1 %1130 }
 0x594   :  { %v1133_v19 = vmul.f32 0.00390625, %v1131_v17 }
 0x596   :  { %v1135_v20 = vsub.f32 %v1133_v19, %v1134_v18 }
 0x598   :  { %v1136_v21 = vmax.f32 %v1135_v20, 0.0 }
 0x59a   :  { %v1139_v22 = vadd.f32 1e-05, %v1136_v21 }
 0x59c   :  { %1961 = vrsqrt.f32 %v1139_v22 }
 0x5a6   :  { %v1962_v29 = vpop.eup %1961 }
 0x5a7   :  { %v1142_v30 = vmul.f32 %v1962_v29, %v1138_v26  ;;  %v1141_v33 = vmul.f32 %v1962_v29, %v1137_v25 }
 0x5a9   :  { %v1155_v34 = vmul.f32 %v1151_v28, %v1142_v30  ;;  %v1154_v35 = vmul.f32 %v1147_v27, %v1141_v33 }
 0x5ab   :  { %v1168_v36 = vadd.f32 %v1164_v32, %v1155_v34  ;;  %v1167_v37 = vadd.f32 %v1160_v31, %v1154_v35 }
 0x5ad   :  { %v1170_v38 = vpack.c.bf16 %v1168_v36, %v1168_v36  ;;  %v1169_v39 = vpack.c.bf16 %v1167_v37, %v1167_v37 }
 0x5af   :  { %1338 = vmatprep.mubr.bf16.mxu0 %v1170_v38 }
 0x5b0   :  { %1339 = vmatmul.mubr.bf16.vlgmr.msra.gmra.mrb[12].mxu0 %v1169_v39 }
 0x5b1   :  { %1750 = vmatpush3.bf16.msra.mxu0 %v1947_v40  ;;  %1765 = vmatprep.mubr.msk.bf16.mxu0 %vm2428_vm0, %v2427_v0 }
 0x5b2   :  { %1751 = vmatprep.subr.bf16.mxu0 %v2427_v0 }
 0x5b5   :  { %1752 = vmatpush3.bf16.msra.mxu0 %v1948_v41 }
 0x5b6   :  { %1753 = vmatprep.subr.bf16.mxu0 %v2427_v0 }
 0x5b9   :  { %1754 = vmatpush3.bf16.msra.mxu0 %v1949_v48 }
 0x5ba   :  { %1755 = vmatprep.subr.bf16.mxu0 %v2427_v0 }
 0x5bd   :  { %1756 = vmatpush3.bf16.msra.mxu0 %v1950_v50 }
 0x5be   :  { %1757 = vmatprep.subr.bf16.mxu0 %v2427_v0 }
 0x5c1   :  { %1758 = vmatpush3.bf16.msra.mxu0 %v1951_v42 }
 0x5c2   :  { %1759 = vmatprep.subr.bf16.mxu0 %v2427_v0 }
 0x5c5   :  { %1760 = vmatpush3.bf16.msra.mxu0 %v1952_v43 }
 0x5c6   :  { %1761 = vmatprep.subr.bf16.mxu0 %v2427_v0 }
 0x5c9   :  { %1762 = vmatpush3.bf16.msra.mxu0 %v1953_v44 }
 0x5ca   :  { %1763 = vmatprep.subr.bf16.mxu0 %v2427_v0 }
 0x5cd   :  { %1764 = vmatpush3.bf16.msra.mxu0 %v1954_v45 }
 0x5ce   :  { %1769 = vmatprep.subr.bf16.mxu0 %v2427_v0 }
 0x683   :  { %v1709_v46 = vpop.f32.mrb[12].mxu0 }
 0x684   :  { %v1710_v49 = vpop.f32.mrb[13].mxu0 }
 0x685   :  { %v1711_v51 = vadd.f32 %v1710_v49, %v1709_v46  ;;  %v1712_v52 = vpop.f32.mrb[14].mxu0 }
 0x686   :  { %v1713_v53 = vpop.f32.mrb[15].mxu0 }
 0x687   :  { %v1341_v54 = vadd.f32 %v1711_v51, %v1652_v47 }
 0x689   :  { %v1346_v55 = vmax.f32 %v1341_v54, 0.0 }
 0x68b   :  { %v1347_v58 = vpack.c.bf16 %v1346_v55, %v1346_v55 }
 0x68d   :  { %1766 = vmatmul.mubr.bf16.vlgmr.msra.gmra.mrb[16].mxu0 %v1347_v58 }
 0x68e   :  { %1770 = vmatpush3.bf16.msra.mxu0 %v1955_v57  ;;  %1777 = vmatprep.mubr.msk.bf16.mxu0 %vm2428_vm0, %v2427_v0 }
 0x68f   :  { %1771 = vmatprep.subr.bf16.mxu0 %v2427_v0 }
 0x692   :  { %1772 = vmatpush3.bf16.msra.mxu0 %v1956_v60 }
 0x693   :  { %1773 = vmatprep.subr.bf16.mxu0 %v2427_v0 }
 0x696   :  { %1774 = vmatpush3.bf16.msra.mxu0 %v1957_v63 }
 0x697   :  { %1775 = vmatprep.subr.bf16.mxu0 %v2427_v0 }
 0x69a   :  { %1776 = vmatpush3.bf16.msra.mxu0 %v1958_v1 }
 0x760   :  { %v1453_v3 = vpop.f32.mrb[16].mxu0 }
 0x761   :  { %v1454_v4 = vadd.f32 %v1669_v2, %v1453_v3  ;;  %v1767_v5 = vpop.f32.mrb[17].mxu0 }
 0x762   :  { %v1456_v6 = vpop.f32.mrb[18].mxu0 }
 0x763   :  { %v1459_v7 = vmax.f32 %v1454_v4, 0.0  ;;  %v1768_v62 = vpop.f32.mrb[19].mxu0 }
 0x765   :  { %v1460_v8 = vpack.c.bf16 %v1459_v7, %v1459_v7 }
 0x767   :  { %1778 = vmatmul.mubr.msk.bf16.vlgmr.msra.gmra.mrb[20].mxu0 %vm1500_vm2, %v1460_v8 }
 0x83a   :  { %v1538_v9 = vpop.f32.mrb[20].mxu0 }
 0x83b   :  { %v1539_v10 = vadd.f32 %v1678_v61, %v1538_v9  ;;  %v1779_v11 = vpop.f32.mrb[21].mxu0 }
 0x83c   :  { %v1541_v0 = vpop.f32.mrb[22].mxu0 }
 0x83d   :  { %1544 = vst [vmem:[#allocation31] sm:$0xff] %v1539_v10  ;;  %v1780_v12 = vpop.f32.mrb[23].mxu0 }
 0x83e   :  { %2370 = shalt.err (!%p2367_p8)
}
 0x83f   :  { %s2371_s30 = scalar_lea.hbm %s2871_s18, 128 }
 0x840   :  { %p2372_p9 = scmp.ne.s32.totalorder %s2871_s18, %s2371_s30  ;;  %p2375_p10 = scmp.lt.u32.totalorder %s2371_s30, %s2871_s18 }
 0x842   :  { %p2377_p11 = pnand %p2375_p10, %p2372_p9 }
 0x844   :  { %2380 = shalt.err (!%p2377_p11)
}
 0x845   :  { %1554 = dma.vmem_to_hbm [thread:$0]  %s1552_s23, 128, %s2871_s18, [#allocation4]  }
 0x846   :  { %2401 = dma.done.wait [#allocation4], 128  }
 0x847   :  { %2402 = vsyncadd [#allocation4], 4294967168 }
 0x848   :  { %1558 = vsyncpa [#allocation3], 1 }
 0x849   :  { %1559 = vsyncpa [#allocation6], 1 }
 0x84a   :  { %1560 = vsyncpa [#allocation9], 1 }
 0x84b   :  { %1561 = vsyncpa [#allocation12], 1 }
 0x84c   :  { %1562 = vsyncpa [#allocation15], 1 }
 0x84d   :  { %1563 = vsyncpa [#allocation18], 1 }
 0x84e   :  { %1564 = vsyncpa [#allocation21], 1 }
 0x84f   :  { %1565 = vsyncpa [#allocation24], 1 }
 0x850   :  { %1566 = vsyncpa [#allocation27], 1 }
 0x851   :  { %1567 = vsyncpa [#allocation30], 1 }
 0x852   :  { %1568 = vsyncpa [#allocation4], 1 }

</bundles_post_ra>
